<compile_context>
chip_gen: v7x
topology: tpu7x:2x2x1
jax: 0.10.0
libtpu: 0.0.40
codegen_flags: <defaults>
</compile_context>

<pallas_src>
import functools

import jax
import jax.numpy as jnp
import numpy as np
from jax.experimental import pallas as pl
from jax.experimental.pallas import tpu as pltpu

LEAK = 5.398


def _round_up(a, b):
    return (a + b - 1) // b * b


# ---------------------------------------------------------------------------
# Kernel: one output pixel-tile = sum over KH*KW taps of (TILE_P,CI)@(CI,CO_PAD)
# followed by where(y > 0, y, y * 5.398).
# ---------------------------------------------------------------------------
def _convt_kernel(x_ref, w_ref, o_ref, *, kh, kw, pw, tile_p):
    # x_ref: (1, 1, tile_p + halo, CI)   overlapped input pixel tile
    # w_ref: (KH, KW, CI, CO_PAD)        flipped convT weight, lane-padded
    # o_ref: (1, tile_p, CO_PAD)
    acc = jnp.zeros(o_ref.shape[1:], jnp.float32)
    for p in range(kh):
        for q in range(kw):
            off = p * pw + q                                  # static shift
            xs = x_ref[0, 0, pl.ds(off, tile_p), :]           # (tile_p, CI)
            acc = acc + jnp.dot(xs, w_ref[p, q],
                                preferred_element_type=jnp.float32)
    o_ref[0] = jnp.where(acc > 0, acc, acc * LEAK).astype(o_ref.dtype)


# ---------------------------------------------------------------------------
# Wrapper
# ---------------------------------------------------------------------------
@functools.partial(jax.jit, static_argnames=("tile_p",))
def convt_leaky(x, weight, *, tile_p=256):
    """x: (N, CI, H, W) f32; weight: (CI, CO, KH, KW) f32 (PyTorch convT layout).

    Returns where(y > 0, y, 5.398 * y) with y = conv_transpose2d(x, weight,
    stride=1), shape (N, CO, H+KH-1, W+KW-1).
    """
    N, CI, H, W = x.shape
    CI_w, CO, KH, KW = weight.shape
    assert CI == CI_w
    OH, OW = H + KH - 1, W + KW - 1
    PW = W + 2 * (KW - 1)                       # padded row stride

    CO_PAD = _round_up(CO, 128)                 # lane-dense output channels
    M_img = OH * PW                             # flat output pixels per image
    tile_p = _round_up(max(8, min(tile_p, _round_up(M_img, 8))), 8)
    M_pad = _round_up(M_img, tile_p)
    n_tiles = M_pad // tile_p

    halo = (KH - 1) * PW + (KW - 1)             # largest static tap shift
    tile_w = tile_p + halo

    # ---- layout glue (single cheap pass over the small input) -------------
    L_need = M_pad + halo
    PH_pad = -(-L_need // PW)                   # rows of padded image
    pad_top = KH - 1
    pad_bot = PH_pad - pad_top - H              # >= KH-1 by construction
    x_nhwc = jnp.transpose(x, (0, 2, 3, 1))                         # (N,H,W,CI)
    x_padded = jnp.pad(
        x_nhwc, ((0, 0), (pad_top, pad_bot), (KW - 1, KW - 1), (0, 0)))
    x_flat = x_padded.reshape(N, PH_pad * PW, CI)                   # (N,L,CI)

    # Overlapping pixel tiles (~(1 + halo/tile_p)x duplication, not 9x im2col).
    idx = (jnp.arange(n_tiles) * tile_p)[:, None] + jnp.arange(tile_w)[None, :]
    x_tiles = x_flat[:, idx, :]                 # (N, n_tiles, tile_w, CI)

    # convT weight -> flipped correlation weight, zero-padded to CO_PAD lanes.
    w_flip = jnp.flip(weight, axis=(2, 3))                          # (CI,CO,KH,KW)
    w_k = jnp.transpose(w_flip, (2, 3, 0, 1))                       # (KH,KW,CI,CO)
    w_k = jnp.pad(w_k, ((0, 0), (0, 0), (0, 0), (0, CO_PAD - CO)))

    kernel = functools.partial(_convt_kernel, kh=KH, kw=KW, pw=PW, tile_p=tile_p)

    flops = 2 * N * M_pad * KH * KW * CI * CO_PAD
    bytes_accessed = 4 * (N * n_tiles * tile_w * CI
                          + KH * KW * CI * CO_PAD
                          + N * M_pad * CO_PAD)

    out_flat = pl.pallas_call(
        kernel,
        out_shape=jax.ShapeDtypeStruct((N, M_pad, CO_PAD), jnp.float32),
        grid=(N, n_tiles),
        in_specs=[
            pl.BlockSpec((1, 1, tile_w, CI), lambda n, i: (n, i, 0, 0)),
            pl.BlockSpec((KH, KW, CI, CO_PAD), lambda n, i: (0, 0, 0, 0)),
        ],
        out_specs=pl.BlockSpec((1, tile_p, CO_PAD), lambda n, i: (n, i, 0)),
        compiler_params=pltpu.CompilerParams(
            dimension_semantics=("parallel", "parallel"),
            vmem_limit_bytes=32 * 1024 * 1024),
        cost_estimate=pl.CostEstimate(flops=flops, transcendentals=0,
                                      bytes_accessed=bytes_accessed),
    )(x_tiles, w_k)

    # (N, M_pad, CO_PAD) -> strip padding -> NCHW
    out = out_flat[:, :M_img, :CO].reshape(N, OH, PW, CO)[:, :, :OW, :]
    return jnp.transpose(out, (0, 3, 1, 2))


# ---------------------------------------------------------------------------
# Pure-numpy reference: direct conv_transpose2d scatter + leaky gating
# ---------------------------------------------------------------------------
def _ref_convt_leaky(x, weight):
    x = np.asarray(x, np.float32)
    w = np.asarray(weight, np.float32)
    N, CI, H, W = x.shape
    _, CO, KH, KW = w.shape
    OH, OW = H + KH - 1, W + KW - 1
    y = np.zeros((N, CO, OH, OW), np.float32)
    for n in range(N):
        for i in range(H):
            for j in range(W):
                y[n, :, i:i + KH, j:j + KW] += np.tensordot(
                    x[n, :, i, j], w, axes=(0, 0))
    return np.where(y > 0, y, y * LEAK)


if __name__ == "__main__":
    key = jax.random.PRNGKey(0)
    kx, kw = jax.random.split(key)

    # small shapes consistent with the module's forward (NCHW conv input)
    N, CI, H, W = 2, 4, 16, 16
    CO, KH, KW = 8, 3, 3

    x = jax.random.normal(kx, (N, CI, H, W), dtype=jnp.float32)
    weight = jax.random.normal(kw, (CI, CO, KH, KW), dtype=jnp.float32) * 0.1

    out = convt_leaky(x, weight)
    out = jax.block_until_ready(out)

    ref = _ref_convt_leaky(x, weight)
    np.testing.assert_allclose(np.asarray(out), ref, rtol=1e-3, atol=1e-4)

    print("KERNEL_OK")
</pallas_src>

<mosaic_0001>
module attributes {stable_mosaic.version = 11 : i64} {
  func.func @_convt_kernel(%arg0: i32, %arg1: i32, %arg2: memref<1x1x298x4xf32, #tpu.memory_space<vmem>>, %arg3: memref<3x3x4x128xf32, #tpu.memory_space<vmem>>, %arg4: memref<1x256x128xf32, #tpu.memory_space<vmem>>) attributes {dimension_semantics = [#tpu.dimension_semantics<parallel>, #tpu.dimension_semantics<parallel>], iteration_bounds = array<i64: 2, 2>, scalar_prefetch = 0 : i64, scratch_operands = 0 : i64, tpu.core_type = #tpu.core_type<tc>, window_params = [{transform_indices = @transform_0, window_bounds = array<i64: 1, 1, 298, 4>}, {pipeline_mode = #tpu.pipeline_mode<synchronous>, transform_indices = @transform_1, window_bounds = array<i64: 3, 3, 4, 128>}, {transform_indices = @transform_2, window_bounds = array<i64: 1, 256, 128>}]} {
    %cst = arith.constant 0.000000e+00 : f32
    %0 = vector.broadcast %cst : f32 to vector<256x128xf32>
    %c0 = arith.constant 0 : index
    %c0_0 = arith.constant 0 : index
    %c0_1 = arith.constant 0 : index
    %c0_2 = arith.constant 0 : index
    %1 = vector.load %arg2[%c0, %c0_0, %c0_1, %c0_2] : memref<1x1x298x4xf32, #tpu.memory_space<vmem>>, vector<1x1x256x4xf32>
    %2 = vector.shape_cast %1 : vector<1x1x256x4xf32> to vector<256x4xf32>
    %c0_3 = arith.constant 0 : index
    %c0_4 = arith.constant 0 : index
    %c0_5 = arith.constant 0 : index
    %c0_6 = arith.constant 0 : index
    %3 = vector.load %arg3[%c0_3, %c0_4, %c0_5, %c0_6] : memref<3x3x4x128xf32, #tpu.memory_space<vmem>>, vector<1x1x4x128xf32>
    %4 = vector.shape_cast %3 : vector<1x1x4x128xf32> to vector<4x128xf32>
    %cst_7 = arith.constant dense<0.000000e+00> : vector<256x128xf32>
    %5 = tpu.matmul %2, %4, %cst_7 {dimension_numbers = #tpu.dot_dimension_numbers<[1], [0], [0], [1], [0, 0, 1, 1], [], []>} : vector<256x4xf32>, vector<4x128xf32>, vector<256x128xf32> -> vector<256x128xf32>
    %6 = arith.addf %0, %5 : vector<256x128xf32>
    %c0_8 = arith.constant 0 : index
    %c0_9 = arith.constant 0 : index
    %c1 = arith.constant 1 : index
    %c0_10 = arith.constant 0 : index
    %7 = vector.load %arg2[%c0_8, %c0_9, %c1, %c0_10] : memref<1x1x298x4xf32, #tpu.memory_space<vmem>>, vector<1x1x256x4xf32>
    %8 = vector.shape_cast %7 : vector<1x1x256x4xf32> to vector<256x4xf32>
    %c0_11 = arith.constant 0 : index
    %c1_12 = arith.constant 1 : index
    %c0_13 = arith.constant 0 : index
    %c0_14 = arith.constant 0 : index
    %9 = vector.load %arg3[%c0_11, %c1_12, %c0_13, %c0_14] : memref<3x3x4x128xf32, #tpu.memory_space<vmem>>, vector<1x1x4x128xf32>
    %10 = vector.shape_cast %9 : vector<1x1x4x128xf32> to vector<4x128xf32>
    %cst_15 = arith.constant dense<0.000000e+00> : vector<256x128xf32>
    %11 = tpu.matmul %8, %10, %cst_15 {dimension_numbers = #tpu.dot_dimension_numbers<[1], [0], [0], [1], [0, 0, 1, 1], [], []>} : vector<256x4xf32>, vector<4x128xf32>, vector<256x128xf32> -> vector<256x128xf32>
    %12 = arith.addf %6, %11 : vector<256x128xf32>
    %c0_16 = arith.constant 0 : index
    %c0_17 = arith.constant 0 : index
    %c2 = arith.constant 2 : index
    %c0_18 = arith.constant 0 : index
    %13 = vector.load %arg2[%c0_16, %c0_17, %c2, %c0_18] : memref<1x1x298x4xf32, #tpu.memory_space<vmem>>, vector<1x1x256x4xf32>
    %14 = vector.shape_cast %13 : vector<1x1x256x4xf32> to vector<256x4xf32>
    %c0_19 = arith.constant 0 : index
    %c2_20 = arith.constant 2 : index
    %c0_21 = arith.constant 0 : index
    %c0_22 = arith.constant 0 : index
    %15 = vector.load %arg3[%c0_19, %c2_20, %c0_21, %c0_22] : memref<3x3x4x128xf32, #tpu.memory_space<vmem>>, vector<1x1x4x128xf32>
    %16 = vector.shape_cast %15 : vector<1x1x4x128xf32> to vector<4x128xf32>
    %cst_23 = arith.constant dense<0.000000e+00> : vector<256x128xf32>
    %17 = tpu.matmul %14, %16, %cst_23 {dimension_numbers = #tpu.dot_dimension_numbers<[1], [0], [0], [1], [0, 0, 1, 1], [], []>} : vector<256x4xf32>, vector<4x128xf32>, vector<256x128xf32> -> vector<256x128xf32>
    %18 = arith.addf %12, %17 : vector<256x128xf32>
    %c0_24 = arith.constant 0 : index
    %c0_25 = arith.constant 0 : index
    %c20 = arith.constant 20 : index
    %c0_26 = arith.constant 0 : index
    %19 = vector.load %arg2[%c0_24, %c0_25, %c20, %c0_26] : memref<1x1x298x4xf32, #tpu.memory_space<vmem>>, vector<1x1x256x4xf32>
    %20 = vector.shape_cast %19 : vector<1x1x256x4xf32> to vector<256x4xf32>
    %c1_27 = arith.constant 1 : index
    %c0_28 = arith.constant 0 : index
    %c0_29 = arith.constant 0 : index
    %c0_30 = arith.constant 0 : index
    %21 = vector.load %arg3[%c1_27, %c0_28, %c0_29, %c0_30] : memref<3x3x4x128xf32, #tpu.memory_space<vmem>>, vector<1x1x4x128xf32>
    %22 = vector.shape_cast %21 : vector<1x1x4x128xf32> to vector<4x128xf32>
    %cst_31 = arith.constant dense<0.000000e+00> : vector<256x128xf32>
    %23 = tpu.matmul %20, %22, %cst_31 {dimension_numbers = #tpu.dot_dimension_numbers<[1], [0], [0], [1], [0, 0, 1, 1], [], []>} : vector<256x4xf32>, vector<4x128xf32>, vector<256x128xf32> -> vector<256x128xf32>
    %24 = arith.addf %18, %23 : vector<256x128xf32>
    %c0_32 = arith.constant 0 : index
    %c0_33 = arith.constant 0 : index
    %c21 = arith.constant 21 : index
    %c0_34 = arith.constant 0 : index
    %25 = vector.load %arg2[%c0_32, %c0_33, %c21, %c0_34] : memref<1x1x298x4xf32, #tpu.memory_space<vmem>>, vector<1x1x256x4xf32>
    %26 = vector.shape_cast %25 : vector<1x1x256x4xf32> to vector<256x4xf32>
    %c1_35 = arith.constant 1 : index
    %c1_36 = arith.constant 1 : index
    %c0_37 = arith.constant 0 : index
    %c0_38 = arith.constant 0 : index
    %27 = vector.load %arg3[%c1_35, %c1_36, %c0_37, %c0_38] : memref<3x3x4x128xf32, #tpu.memory_space<vmem>>, vector<1x1x4x128xf32>
    %28 = vector.shape_cast %27 : vector<1x1x4x128xf32> to vector<4x128xf32>
    %cst_39 = arith.constant dense<0.000000e+00> : vector<256x128xf32>
    %29 = tpu.matmul %26, %28, %cst_39 {dimension_numbers = #tpu.dot_dimension_numbers<[1], [0], [0], [1], [0, 0, 1, 1], [], []>} : vector<256x4xf32>, vector<4x128xf32>, vector<256x128xf32> -> vector<256x128xf32>
    %30 = arith.addf %24, %29 : vector<256x128xf32>
    %c0_40 = arith.constant 0 : index
    %c0_41 = arith.constant 0 : index
    %c22 = arith.constant 22 : index
    %c0_42 = arith.constant 0 : index
    %31 = vector.load %arg2[%c0_40, %c0_41, %c22, %c0_42] : memref<1x1x298x4xf32, #tpu.memory_space<vmem>>, vector<1x1x256x4xf32>
    %32 = vector.shape_cast %31 : vector<1x1x256x4xf32> to vector<256x4xf32>
    %c1_43 = arith.constant 1 : index
    %c2_44 = arith.constant 2 : index
    %c0_45 = arith.constant 0 : index
    %c0_46 = arith.constant 0 : index
    %33 = vector.load %arg3[%c1_43, %c2_44, %c0_45, %c0_46] : memref<3x3x4x128xf32, #tpu.memory_space<vmem>>, vector<1x1x4x128xf32>
    %34 = vector.shape_cast %33 : vector<1x1x4x128xf32> to vector<4x128xf32>
    %cst_47 = arith.constant dense<0.000000e+00> : vector<256x128xf32>
    %35 = tpu.matmul %32, %34, %cst_47 {dimension_numbers = #tpu.dot_dimension_numbers<[1], [0], [0], [1], [0, 0, 1, 1], [], []>} : vector<256x4xf32>, vector<4x128xf32>, vector<256x128xf32> -> vector<256x128xf32>
    %36 = arith.addf %30, %35 : vector<256x128xf32>
    %c0_48 = arith.constant 0 : index
    %c0_49 = arith.constant 0 : index
    %c40 = arith.constant 40 : index
    %c0_50 = arith.constant 0 : index
    %37 = vector.load %arg2[%c0_48, %c0_49, %c40, %c0_50] : memref<1x1x298x4xf32, #tpu.memory_space<vmem>>, vector<1x1x256x4xf32>
    %38 = vector.shape_cast %37 : vector<1x1x256x4xf32> to vector<256x4xf32>
    %c2_51 = arith.constant 2 : index
    %c0_52 = arith.constant 0 : index
    %c0_53 = arith.constant 0 : index
    %c0_54 = arith.constant 0 : index
    %39 = vector.load %arg3[%c2_51, %c0_52, %c0_53, %c0_54] : memref<3x3x4x128xf32, #tpu.memory_space<vmem>>, vector<1x1x4x128xf32>
    %40 = vector.shape_cast %39 : vector<1x1x4x128xf32> to vector<4x128xf32>
    %cst_55 = arith.constant dense<0.000000e+00> : vector<256x128xf32>
    %41 = tpu.matmul %38, %40, %cst_55 {dimension_numbers = #tpu.dot_dimension_numbers<[1], [0], [0], [1], [0, 0, 1, 1], [], []>} : vector<256x4xf32>, vector<4x128xf32>, vector<256x128xf32> -> vector<256x128xf32>
    %42 = arith.addf %36, %41 : vector<256x128xf32>
    %c0_56 = arith.constant 0 : index
    %c0_57 = arith.constant 0 : index
    %c41 = arith.constant 41 : index
    %c0_58 = arith.constant 0 : index
    %43 = vector.load %arg2[%c0_56, %c0_57, %c41, %c0_58] : memref<1x1x298x4xf32, #tpu.memory_space<vmem>>, vector<1x1x256x4xf32>
    %44 = vector.shape_cast %43 : vector<1x1x256x4xf32> to vector<256x4xf32>
    %c2_59 = arith.constant 2 : index
    %c1_60 = arith.constant 1 : index
    %c0_61 = arith.constant 0 : index
    %c0_62 = arith.constant 0 : index
    %45 = vector.load %arg3[%c2_59, %c1_60, %c0_61, %c0_62] : memref<3x3x4x128xf32, #tpu.memory_space<vmem>>, vector<1x1x4x128xf32>
    %46 = vector.shape_cast %45 : vector<1x1x4x128xf32> to vector<4x128xf32>
    %cst_63 = arith.constant dense<0.000000e+00> : vector<256x128xf32>
    %47 = tpu.matmul %44, %46, %cst_63 {dimension_numbers = #tpu.dot_dimension_numbers<[1], [0], [0], [1], [0, 0, 1, 1], [], []>} : vector<256x4xf32>, vector<4x128xf32>, vector<256x128xf32> -> vector<256x128xf32>
    %48 = arith.addf %42, %47 : vector<256x128xf32>
    %c0_64 = arith.constant 0 : index
    %c0_65 = arith.constant 0 : index
    %c42 = arith.constant 42 : index
    %c0_66 = arith.constant 0 : index
    %49 = vector.load %arg2[%c0_64, %c0_65, %c42, %c0_66] : memref<1x1x298x4xf32, #tpu.memory_space<vmem>>, vector<1x1x256x4xf32>
    %50 = vector.shape_cast %49 : vector<1x1x256x4xf32> to vector<256x4xf32>
    %c2_67 = arith.constant 2 : index
    %c2_68 = arith.constant 2 : index
    %c0_69 = arith.constant 0 : index
    %c0_70 = arith.constant 0 : index
    %51 = vector.load %arg3[%c2_67, %c2_68, %c0_69, %c0_70] : memref<3x3x4x128xf32, #tpu.memory_space<vmem>>, vector<1x1x4x128xf32>
    %52 = vector.shape_cast %51 : vector<1x1x4x128xf32> to vector<4x128xf32>
    %cst_71 = arith.constant dense<0.000000e+00> : vector<256x128xf32>
    %53 = tpu.matmul %50, %52, %cst_71 {dimension_numbers = #tpu.dot_dimension_numbers<[1], [0], [0], [1], [0, 0, 1, 1], [], []>} : vector<256x4xf32>, vector<4x128xf32>, vector<256x128xf32> -> vector<256x128xf32>
    %54 = arith.addf %48, %53 : vector<256x128xf32>
    %cst_72 = arith.constant 0.000000e+00 : f32
    %55 = vector.broadcast %cst_72 : f32 to vector<256x128xf32>
    %56 = arith.cmpf ogt, %54, %55 : vector<256x128xf32>
    %cst_73 = arith.constant 5.398000e+00 : f32
    %57 = vector.broadcast %cst_73 : f32 to vector<256x128xf32>
    %58 = arith.mulf %54, %57 : vector<256x128xf32>
    %59 = arith.select %56, %54, %58 : vector<256x128xi1>, vector<256x128xf32>
    %c0_74 = arith.constant 0 : index
    %c0_75 = arith.constant 0 : index
    %c0_76 = arith.constant 0 : index
    %60 = vector.load %arg4[%c0_74, %c0_75, %c0_76] : memref<1x256x128xf32, #tpu.memory_space<vmem>>, vector<1x256x128xf32>
    %61 = vector.shape_cast %60 : vector<1x256x128xf32> to vector<256x128xf32>
    %62 = vector.shape_cast %59 : vector<256x128xf32> to vector<1x256x128xf32>
    tpu.vector_store %arg4[%c0_74, %c0_75, %c0_76], %62 {strides = array<i32>} : memref<1x256x128xf32, #tpu.memory_space<vmem>>, vector<1x256x128xf32>,
    return
  }
  func.func @transform_0(%arg0: i32, %arg1: i32) -> (i32, i32, i32, i32) {
    %c0_i32 = arith.constant 0 : i32
    %c0_i32_0 = arith.constant 0 : i32
    %c0_i32_1 = arith.constant 0 : i32
    return %arg0, %arg1, %c0_i32, %c0_i32_0 : i32, i32, i32, i32
  }
  func.func @transform_1(%arg0: i32, %arg1: i32) -> (i32, i32, i32, i32) {
    %c0_i32 = arith.constant 0 : i32
    %c0_i32_0 = arith.constant 0 : i32
    %c0_i32_1 = arith.constant 0 : i32
    %c0_i32_2 = arith.constant 0 : i32
    %c0_i32_3 = arith.constant 0 : i32
    return %c0_i32, %c0_i32_0, %c0_i32_1, %c0_i32_2 : i32, i32, i32, i32
  }
  func.func @transform_2(%arg0: i32, %arg1: i32) -> (i32, i32, i32) {
    %c0_i32 = arith.constant 0 : i32
    %c0_i32_0 = arith.constant 0 : i32
    return %arg0, %arg1, %c0_i32 : i32, i32, i32
  }
}

</mosaic_0001>

<bundles_post_ra>
// kernel: convt_leaky.1
= control target key start
LH: loop header
LB: loop body
LE: loop exit
PB: predicated region body
PF: predicated region fallthrough
CT: control target
= control target key end

     0   :  { %s5267_s9 = smov 0   ;;  %s5269_s10 = smov 0   ;;  %s6168_s0 = inlined_call_operand.vmem [shape: f32[2,2,298,4], index: 0, kind: input, shape index: {}]   ;;  %s6169_s1 = inlined_call_operand.vmem [shape: f32[3,3,4,128], index: 1, kind: input, shape index: {}]   ;;  %s6170_s2 = inlined_call_operand.vmem [shape: f32[2,512,128], index: 2, kind: output, shape index: {}]  }
   0x1   :  { %s5271_s11 = smov 0   ;;  %s5273_s12 = smov 0  }
   0x2   :  { %s5275_s13 = smov 0  }
   0x3 LB: > { %s21_s14 = sadd.s32 1, %s5242_s11  ;;  %s24_s15 = sadd.s32 1, %s5246_s12  ;;  %s5250_s13 = sphi %s5275_s13, %s12_s13   ;;  %s5246_s12 = sphi %s5273_s12, %s6174_s12   ;;  %s5242_s11 = sphi %s5271_s11, %s6173_s11   ;;  %s5238_s10 = sphi %s5269_s10, %s6172_s10   ;;  %s5234_s9 = sphi %s5267_s9, %s6171_s9  }
   0x4   : > { %p22_p0 = scmp.ge.s32.totalorder %s21_s14, 2  ;;  %p3853_p1 = scmp.ge.s32.totalorder %s5250_s13, 1 }
   0x5   : > { %p132_p2 = scmp.lt.s32.totalorder %s5250_s13, 5 }
   0x6   : > { %s6176_s14 = smov (%p22_p0, %s21_s14), 0  ;;  %s6178_s15 = smov (!%p22_p0, %s24_s15), %s5246_s12 }
   0x7   : > { %p133_p3 = pnand %p3853_p1, %p132_p2  ;;  %p26_p4 = scmp.ge.s32.totalorder %s6178_s15, 2 }
   0x8   : > { %v3858_v0 = vld [vmem:[%s6169_s1 + $0x4] sm:$0xf] (!%p133_p3)  ;;  %vm345_vm0 = vcmask (!%p133_p3), 1043456   ;;  %v5305_v1 = vld [vmem:[%s6169_s1 + $0x10] sm:$0xf] (!%p133_p3)  ;;  %p162_p5 = scmp.lt.s32.totalorder (!%p133_p3), %s5238_s10, 1 }
   0x9   : > { %s6180_s15 = smov (%p26_p4, %s6178_s15), 0  ;;  %136 = sbr.rel (%p133_p3) target bundleno = 529 (0x211), region = 28 }
   0xa   : > { %4462 = vmatprep.subr.msk.mxu1 (!%p133_p3), %vm345_vm0, %v3858_v0  ;;  %4662 = vmatprep.subr.msk.mxu0 (!%p133_p3), %vm345_vm0, %v5305_v1  ;;  %p164_p6 = scmp.lt.s32.totalorder (!%p133_p3), %s5234_s9, 1  ;;  %v213_v2 = vld [vmem:[%s6169_s1] sm:$0xf] (!%p133_p3)  ;;  %v4027_v3 = vld [vmem:[%s6169_s1 + $0x14] sm:$0xf] (!%p133_p3)  ;;  %vm248_vm1 = vcmask (!%p133_p3), 31744  }
   0xb   : > { %4463 = vmatpush3.msk.msra.mxu1 (!%p133_p3), %vm345_vm0, %v3858_v0  ;;  %4663 = vmatpush3.msk.msra.mxu0 (!%p133_p3), %vm345_vm0, %v5305_v1  ;;  %v5344_v10 = vld [vmem:[%s6169_s1 + $0x18] sm:$0xf] (!%p133_p3)  ;;  %v5349_v11 = vld [vmem:[%s6169_s1 + $0x8] sm:$0xf] (!%p133_p3)  ;;  %v5462_v44 = vld [vmem:[%s6169_s1 + $0x1c] sm:$0xf] (!%p133_p3) }
   0xc   : > { %4512 = vmatprep.subr.msk.mxu1 (!%p133_p3), %vm345_vm0, %v213_v2  ;;  %4712 = vmatprep.subr.msk.mxu0 (!%p133_p3), %vm345_vm0, %v4027_v3  ;;  %s3855_s21 = sshll.u32 (!%p133_p3), %s5234_s9, 5 }
   0xd   : > { %p174_p7 = scmp.lt.s32.totalorder (!%p133_p3), %s3855_s21, 63 }
  0x10   : > { %s6182_s10 = smov (!%p162_p5, %s5238_s10), 1  ;;  %s6184_s21 = smov (!%p174_p7, %s3855_s21), 63 }
  0x11   : > { %s165_s24 = scalar_select %p164_p6, %s5234_s9, 1 }
  0x12   : > { %s5171_s25 = smul.u32 76, %s6182_s10  ;;  %s3856_s22 = sshll.u32 %s6182_s10, 6 }
  0x13   : > { %s5170_s26 = smul.u32 38, %s165_s24  ;;  %s177_s23 = sadd.s32 %s3856_s22, %s6184_s21 }
  0x14   : > { %s3857_s24 = sshll.u32 %s177_s23, 3 }
  0x15   : > { %s168_s27 = sadd.s32 %s5171_s25, %s5170_s26  ;;  %s6112_s26 = scalar_lea.vmem %s6170_s2, %s3857_s24 }
  0x16   : > { %s3854_s28 = sshll.u32 %s168_s27, 3 }
  0x17   : > { %s5329_s3 = scalar_lea.vmem %s6168_s0, %s3854_s28 }
  0x18   : > { %v214_v4 = vld [vmem:[%s5329_s3 + $0x1] sm:$0xff]  ;;  %v1678_v5 = vld [vmem:[%s5329_s3 + $0x15] sm:$0xff]  ;;  %v215_v6 = vld [vmem:[%s5329_s3 + $0x9] sm:$0xff] }
  0x19   : > { %4464 = vmatprep.mubr.msk.f32.mxu1 %vm248_vm1, %v214_v4  ;;  %4664 = vmatprep.mubr.msk.f32.mxu0 %vm248_vm1, %v1678_v5  ;;  %v1679_v7 = vld [vmem:[%s5329_s3 + $0x1d] sm:$0xff]  ;;  %v216_v8 = vld [vmem:[%s5329_s3 + $0x11] sm:$0xff]  ;;  %v1680_v9 = vld [vmem:[%s5329_s3 + $0x25] sm:$0xff] }
  0x1a   : > { %4465 = vmatmul.mubr.msk.f32.vlgmr.msra.gmra.mrb[0].mxu1 %vm248_vm1, %v215_v6  ;;  %4665 = vmatmul.mubr.msk.f32.vlgmr.msra.gmra.mrb[0].mxu0 %vm248_vm1, %v1679_v7  ;;  %v217_v12 = vld [vmem:[%s5329_s3 + $0x19] sm:$0xff]  ;;  %v1681_v13 = vld [vmem:[%s5329_s3 + $0x2d] sm:$0xff]  ;;  %v218_v14 = vld [vmem:[%s5329_s3 + $0x21] sm:$0xff] }
  0x1b   : > { %4513 = vmatpush3.msk.msra.mxu1 %vm345_vm0, %v213_v2  ;;  %4713 = vmatpush3.msk.msra.mxu0 %vm345_vm0, %v4027_v3  ;;  %v1682_v15 = vld [vmem:[%s5329_s3 + $0x35] sm:$0xff]  ;;  %v5368_v16 = vld [vmem:[%s5329_s3 + $0x29] sm:$0xff]  ;;  %v1683_v17 = vld [vmem:[%s5329_s3 + $0x3d] sm:$0xff] }
  0x1c   : > { %4467 = vmatprep.mubr.msk.f32.mxu1 %vm248_vm1, %v216_v8  ;;  %4667 = vmatprep.mubr.msk.f32.mxu0 %vm248_vm1, %v1680_v9  ;;  %v5372_v18 = vld [vmem:[%s5329_s3 + $0x31] sm:$0xff]  ;;  %v1684_v19 = vld [vmem:[%s5329_s3 + $0x45] sm:$0xff]  ;;  %v5382_v20 = vld [vmem:[%s5329_s3 + $0x39] sm:$0xff] }
  0x1d   : > { %4762 = vmatprep.subr.msk.mxu0 %vm345_vm0, %v5344_v10  ;;  %4562 = vmatprep.subr.msk.mxu1 %vm345_vm0, %v5349_v11  ;;  %v1685_v21 = vld [vmem:[%s5329_s3 + $0x4d] sm:$0xff]  ;;  %v5386_v22 = vld [vmem:[%s5329_s3 + $0x41] sm:$0xff]  ;;  %v1686_v23 = vld [vmem:[%s5329_s3 + $0x55] sm:$0xff] }
  0x1e   : > { %4468 = vmatmul.mubr.msk.f32.gmra.mrb[2].mxu1 %vm248_vm1, %v217_v12  ;;  %4668 = vmatmul.mubr.msk.f32.gmra.mrb[2].mxu0 %vm248_vm1, %v1681_v13  ;;  %v5396_v24 = vld [vmem:[%s5329_s3 + $0x49] sm:$0xff]  ;;  %v1687_v25 = vld [vmem:[%s5329_s3 + $0x5d] sm:$0xff]  ;;  %v5400_v26 = vld [vmem:[%s5329_s3 + $0x51] sm:$0xff] }
  0x1f   : > { %4470 = vmatprep.mubr.msk.f32.mxu1 %vm248_vm1, %v218_v14  ;;  %4670 = vmatprep.mubr.msk.f32.mxu0 %vm248_vm1, %v1682_v15  ;;  %v1688_v27 = vld [vmem:[%s5329_s3 + $0x65] sm:$0xff]  ;;  %v5410_v28 = vld [vmem:[%s5329_s3 + $0x59] sm:$0xff]  ;;  %v1689_v29 = vld [vmem:[%s5329_s3 + $0x6d] sm:$0xff] }
  0x20   : > { %v5414_v30 = vld [vmem:[%s5329_s3 + $0x61] sm:$0xff]  ;;  %v1690_v31 = vld [vmem:[%s5329_s3 + $0x75] sm:$0xff]  ;;  %v5424_v32 = vld [vmem:[%s5329_s3 + $0x69] sm:$0xff] }
  0x21   : > { %v1691_v33 = vld [vmem:[%s5329_s3 + $0x7d] sm:$0xff]  ;;  %v5428_v34 = vld [vmem:[%s5329_s3 + $0x71] sm:$0xff]  ;;  %v1692_v35 = vld [vmem:[%s5329_s3 + $0x85] sm:$0xff] }
  0x22   : > { %4471 = vmatmul.mubr.msk.f32.gmra.mrb[4].mxu1 %vm248_vm1, %v5368_v16  ;;  %4671 = vmatmul.mubr.msk.f32.gmra.mrb[4].mxu0 %vm248_vm1, %v1683_v17  ;;  %v5438_v36 = vld [vmem:[%s5329_s3 + $0x79] sm:$0xff]  ;;  %v1693_v37 = vld [vmem:[%s5329_s3 + $0x8d] sm:$0xff]  ;;  %v5442_v38 = vld [vmem:[%s5329_s3 + $0x81] sm:$0xff] }
  0x23   : > { %4473 = vmatprep.mubr.msk.f32.mxu1 %vm248_vm1, %v5372_v18  ;;  %4673 = vmatprep.mubr.msk.f32.mxu0 %vm248_vm1, %v1684_v19  ;;  %v2068_v39 = vld [vmem:[%s5329_s3 + $0x16] sm:$0xff]  ;;  %v5452_v40 = vld [vmem:[%s5329_s3 + $0x89] sm:$0xff]  ;;  %v2069_v41 = vld [vmem:[%s5329_s3 + $0x1e] sm:$0xff] }
  0x24   : > { %v5456_v42 = vld [vmem:[%s5329_s3 + $0x91] sm:$0xff]  ;;  %v2070_v43 = vld [vmem:[%s5329_s3 + $0x26] sm:$0xff]  ;;  %v5472_v45 = vld [vmem:[%s5329_s3 + $0x99] sm:$0xff] }
  0x25   : > { %v2071_v46 = vld [vmem:[%s5329_s3 + $0x2e] sm:$0xff]  ;;  %v5477_v47 = vld [vmem:[%s5329_s3 + $0xa1] sm:$0xff]  ;;  %v2072_v48 = vld [vmem:[%s5329_s3 + $0x36] sm:$0xff] }
  0x26   : > { %4474 = vmatmul.mubr.msk.f32.gmra.mrb[6].mxu1 %vm248_vm1, %v5382_v20  ;;  %4674 = vmatmul.mubr.msk.f32.gmra.mrb[6].mxu0 %vm248_vm1, %v1685_v21  ;;  %v5489_v49 = vld [vmem:[%s5329_s3 + $0xa9] sm:$0xff]  ;;  %v2073_v50 = vld [vmem:[%s5329_s3 + $0x3e] sm:$0xff]  ;;  %v5493_v51 = vld [vmem:[%s5329_s3 + $0xb1] sm:$0xff] }
  0x27   : > { %4476 = vmatprep.mubr.msk.f32.mxu1 %vm248_vm1, %v5386_v22  ;;  %4676 = vmatprep.mubr.msk.f32.mxu0 %vm248_vm1, %v1686_v23  ;;  %v2074_v52 = vld [vmem:[%s5329_s3 + $0x46] sm:$0xff]  ;;  %v5503_v53 = vld [vmem:[%s5329_s3 + $0xb9] sm:$0xff]  ;;  %v2075_v54 = vld [vmem:[%s5329_s3 + $0x4e] sm:$0xff] }
  0x28   : > { %v5507_v55 = vld [vmem:[%s5329_s3 + $0xc1] sm:$0xff]  ;;  %v2076_v56 = vld [vmem:[%s5329_s3 + $0x56] sm:$0xff]  ;;  %v5517_v57 = vld [vmem:[%s5329_s3 + $0xc9] sm:$0xff] }
  0x29   : > { %v2077_v58 = vld [vmem:[%s5329_s3 + $0x5e] sm:$0xff]  ;;  %v5521_v59 = vld [vmem:[%s5329_s3 + $0xd1] sm:$0xff]  ;;  %v2078_v60 = vld [vmem:[%s5329_s3 + $0x66] sm:$0xff] }
  0x2a   : > { %4477 = vmatmul.mubr.msk.f32.gmra.mrb[8].mxu1 %vm248_vm1, %v5396_v24  ;;  %4677 = vmatmul.mubr.msk.f32.gmra.mrb[8].mxu0 %vm248_vm1, %v1687_v25  ;;  %v5531_v61 = vld [vmem:[%s5329_s3 + $0xd9] sm:$0xff]  ;;  %v2079_v62 = vld [vmem:[%s5329_s3 + $0x6e] sm:$0xff]  ;;  %v5535_v63 = vld [vmem:[%s5329_s3 + $0xe1] sm:$0xff] }
  0x2b   : > { %4479 = vmatprep.mubr.msk.f32.mxu1 %vm248_vm1, %v5400_v26  ;;  %4679 = vmatprep.mubr.msk.f32.mxu0 %vm248_vm1, %v1688_v27  ;;  %v2080_v0 = vld [vmem:[%s5329_s3 + $0x76] sm:$0xff]  ;;  %v5545_v2 = vld [vmem:[%s5329_s3 + $0xe9] sm:$0xff]  ;;  %v2081_v3 = vld [vmem:[%s5329_s3 + $0x7e] sm:$0xff] }
  0x2c   : > { %v5549_v4 = vld [vmem:[%s5329_s3 + $0xf1] sm:$0xff]  ;;  %v2082_v5 = vld [vmem:[%s5329_s3 + $0x86] sm:$0xff]  ;;  %v5559_v6 = vld [vmem:[%s5329_s3 + $0xf9] sm:$0xff] }
  0x2d   : > { %v2083_v7 = vld [vmem:[%s5329_s3 + $0x8e] sm:$0xff]  ;;  %v181_v8 = vld [vmem:[%s5329_s3] sm:$0xff]  ;;  %v2084_v9 = vld [vmem:[%s5329_s3 + $0x96] sm:$0xff] }
  0x2e   : > { %4480 = vmatmul.mubr.msk.f32.gmra.mrb[10].mxu1 %vm248_vm1, %v5410_v28  ;;  %4680 = vmatmul.mubr.msk.f32.gmra.mrb[10].mxu0 %vm248_vm1, %v1689_v29  ;;  %v2085_v12 = vld [vmem:[%s5329_s3 + $0x9e] sm:$0xff]  ;;  %v183_v13 = vld [vmem:[%s5329_s3 + $0x10] sm:$0xff]  ;;  %v2086_v14 = vld [vmem:[%s5329_s3 + $0xa6] sm:$0xff] }
  0x2f   : > { %4482 = vmatprep.mubr.msk.f32.mxu1 %vm248_vm1, %v5414_v30  ;;  %4682 = vmatprep.mubr.msk.f32.mxu0 %vm248_vm1, %v1690_v31  ;;  %v5576_v15 = vld [vmem:[%s6169_s1 + $0xc] sm:$0xf]  ;;  %v184_v17 = vld [vmem:[%s5329_s3 + $0x18] sm:$0xff]  ;;  %v185_v21 = vld [vmem:[%s5329_s3 + $0x20] sm:$0xff] }
  0x30   : > { %v2087_v19 = vld [vmem:[%s5329_s3 + $0xae] sm:$0xff]  ;;  %v2088_v23 = vld [vmem:[%s5329_s3 + $0xb6] sm:$0xff]  ;;  %v2089_v25 = vld [vmem:[%s5329_s3 + $0xbe] sm:$0xff] }
  0x31   : > { %v187_v27 = vld [vmem:[%s5329_s3 + $0x30] sm:$0xff]  ;;  %v2090_v29 = vld [vmem:[%s5329_s3 + $0xc6] sm:$0xff]  ;;  %v188_v31 = vld [vmem:[%s5329_s3 + $0x38] sm:$0xff] }
  0x32   : > { %4483 = vmatmul.mubr.msk.f32.gmra.mrb[12].mxu1 %vm248_vm1, %v5424_v32  ;;  %4683 = vmatmul.mubr.msk.f32.gmra.mrb[12].mxu0 %vm248_vm1, %v1691_v33  ;;  %v2091_v33 = vld [vmem:[%s5329_s3 + $0xce] sm:$0xff] }
  0x33   : > { %4485 = vmatprep.mubr.msk.f32.mxu1 %vm248_vm1, %v5428_v34  ;;  %4685 = vmatprep.mubr.msk.f32.mxu0 %vm248_vm1, %v1692_v35  ;;  %v189_v35 = vld [vmem:[%s5329_s3 + $0x40] sm:$0xff] }
  0x36   : > { %4486 = vmatmul.mubr.msk.f32.gmra.mrb[14].mxu1 %vm248_vm1, %v5438_v36  ;;  %4686 = vmatmul.mubr.msk.f32.gmra.mrb[14].mxu0 %vm248_vm1, %v1693_v37  ;;  %v2092_v37 = vld [vmem:[%s5329_s3 + $0xd6] sm:$0xff] }
  0x37   : > { %4488 = vmatprep.mubr.msk.f32.mxu1 %vm248_vm1, %v5442_v38  ;;  %4714 = vmatprep.mubr.msk.f32.mxu0 %vm248_vm1, %v2068_v39  ;;  %v190_v39 = vld [vmem:[%s5329_s3 + $0x48] sm:$0xff] }
  0x3a   : > { %4489 = vmatmul.mubr.msk.f32.gmra.mrb[16].mxu1 %vm248_vm1, %v5452_v40  ;;  %4715 = vmatmul.mubr.msk.f32.vlgmr.msra.gmra.mrb[0].mxu0 %vm248_vm1, %v2069_v41  ;;  %v2093_v41 = vld [vmem:[%s5329_s3 + $0xde] sm:$0xff] }
  0x3b   : > { %4763 = vmatpush3.msk.msra.mxu0 %vm345_vm0, %v5344_v10  ;;  %4491 = vmatprep.mubr.msk.f32.mxu1 %vm248_vm1, %v5456_v42  ;;  %v182_v10 = vld [vmem:[%s5329_s3 + $0x8] sm:$0xff] }
  0x3c   : > { %4717 = vmatprep.mubr.msk.f32.mxu0 %vm248_vm1, %v2070_v43  ;;  %4812 = vmatprep.subr.msk.mxu0 %vm345_vm0, %v5462_v44  ;;  %v191_v43 = vld [vmem:[%s5329_s3 + $0x50] sm:$0xff] }
  0x3e   : > { %4492 = vmatmul.mubr.msk.f32.gmra.mrb[18].mxu1 %vm248_vm1, %v5472_v45  ;;  %4718 = vmatmul.mubr.msk.f32.gmra.mrb[2].mxu0 %vm248_vm1, %v2071_v46  ;;  %v2094_v46 = vld [vmem:[%s5329_s3 + $0xe6] sm:$0xff] }
  0x3f   : > { %4494 = vmatprep.mubr.msk.f32.mxu1 %vm248_vm1, %v5477_v47  ;;  %4720 = vmatprep.mubr.msk.f32.mxu0 %vm248_vm1, %v2072_v48  ;;  %v192_v48 = vld [vmem:[%s5329_s3 + $0x58] sm:$0xff] }
  0x42   : > { %4495 = vmatmul.mubr.msk.f32.gmra.mrb[20].mxu1 %vm248_vm1, %v5489_v49  ;;  %4721 = vmatmul.mubr.msk.f32.gmra.mrb[4].mxu0 %vm248_vm1, %v2073_v50  ;;  %v2095_v50 = vld [vmem:[%s5329_s3 + $0xee] sm:$0xff] }
  0x43   : > { %4497 = vmatprep.mubr.msk.f32.mxu1 %vm248_vm1, %v5493_v51  ;;  %4723 = vmatprep.mubr.msk.f32.mxu0 %vm248_vm1, %v2074_v52  ;;  %v193_v52 = vld [vmem:[%s5329_s3 + $0x60] sm:$0xff] }
  0x46   : > { %4498 = vmatmul.mubr.msk.f32.gmra.mrb[22].mxu1 %vm248_vm1, %v5503_v53  ;;  %4724 = vmatmul.mubr.msk.f32.gmra.mrb[6].mxu0 %vm248_vm1, %v2075_v54  ;;  %v2096_v54 = vld [vmem:[%s5329_s3 + $0xf6] sm:$0xff] }
  0x47   : > { %4500 = vmatprep.mubr.msk.f32.mxu1 %vm248_vm1, %v5507_v55  ;;  %4726 = vmatprep.mubr.msk.f32.mxu0 %vm248_vm1, %v2076_v56  ;;  %v194_v56 = vld [vmem:[%s5329_s3 + $0x68] sm:$0xff] }
  0x4a   : > { %4501 = vmatmul.mubr.msk.f32.gmra.mrb[24].mxu1 %vm248_vm1, %v5517_v57  ;;  %4727 = vmatmul.mubr.msk.f32.gmra.mrb[8].mxu0 %vm248_vm1, %v2077_v58  ;;  %v2097_v58 = vld [vmem:[%s5329_s3 + $0xfe] sm:$0xff] }
  0x4b   : > { %4503 = vmatprep.mubr.msk.f32.mxu1 %vm248_vm1, %v5521_v59  ;;  %4729 = vmatprep.mubr.msk.f32.mxu0 %vm248_vm1, %v2078_v60  ;;  %v195_v60 = vld [vmem:[%s5329_s3 + $0x70] sm:$0xff] }
  0x4e   : > { %4504 = vmatmul.mubr.msk.f32.gmra.mrb[26].mxu1 %vm248_vm1, %v5531_v61  ;;  %4730 = vmatmul.mubr.msk.f32.gmra.mrb[10].mxu0 %vm248_vm1, %v2079_v62  ;;  %v2098_v62 = vld [vmem:[%s5329_s3 + $0x106] sm:$0xff] }
  0x4f   : > { %4506 = vmatprep.mubr.msk.f32.mxu1 %vm248_vm1, %v5535_v63  ;;  %4732 = vmatprep.mubr.msk.f32.mxu0 %vm248_vm1, %v2080_v0  ;;  %v196_v0 = vld [vmem:[%s5329_s3 + $0x78] sm:$0xff] }
  0x52   : > { %4507 = vmatmul.mubr.msk.f32.gmra.mrb[28].mxu1 %vm248_vm1, %v5545_v2  ;;  %4733 = vmatmul.mubr.msk.f32.gmra.mrb[12].mxu0 %vm248_vm1, %v2081_v3  ;;  %v2099_v3 = vld [vmem:[%s5329_s3 + $0x10e] sm:$0xff] }
  0x53   : > { %4509 = vmatprep.mubr.msk.f32.mxu1 %vm248_vm1, %v5549_v4  ;;  %4735 = vmatprep.mubr.msk.f32.mxu0 %vm248_vm1, %v2082_v5  ;;  %v197_v5 = vld [vmem:[%s5329_s3 + $0x80] sm:$0xff] }
  0x56   : > { %4510 = vmatmul.mubr.msk.f32.gmra.mrb[30].mxu1 %vm248_vm1, %v5559_v6  ;;  %4736 = vmatmul.mubr.msk.f32.gmra.mrb[14].mxu0 %vm248_vm1, %v2083_v7  ;;  %v198_v7 = vld [vmem:[%s5329_s3 + $0x88] sm:$0xff] }
  0x57   : > { %4514 = vmatprep.mubr.msk.f32.mxu1 %vm248_vm1, %v181_v8  ;;  %4738 = vmatprep.mubr.msk.f32.mxu0 %vm248_vm1, %v2084_v9  ;;  %v199_v8 = vld [vmem:[%s5329_s3 + $0x90] sm:$0xff]  ;;  %v5646_v9 = vld [vmem:[%s6169_s1 + $0x20] sm:$0xf] }
  0x5a   : > { %4515 = vmatmul.mubr.msk.f32.vlgmr.msra.gmra.mrb[0].mxu1 %vm248_vm1, %v182_v10  ;;  %4739 = vmatmul.mubr.msk.f32.gmra.mrb[16].mxu0 %vm248_vm1, %v2085_v12  ;;  %v200_v10 = vld [vmem:[%s5329_s3 + $0x98] sm:$0xff]  ;;  %v201_v12 = vld [vmem:[%s5329_s3 + $0xa0] sm:$0xff] }
  0x5b   : > { %4563 = vmatpush3.msk.msra.mxu1 %vm345_vm0, %v5349_v11  ;;  %4517 = vmatprep.mubr.msk.f32.mxu1 %vm248_vm1, %v183_v13  ;;  %v186_v11 = vld [vmem:[%s5329_s3 + $0x28] sm:$0xff]  ;;  %v203_v13 = vld [vmem:[%s5329_s3 + $0xb0] sm:$0xff] }
  0x5c   : > { %4741 = vmatprep.mubr.msk.f32.mxu0 %vm248_vm1, %v2086_v14  ;;  %4612 = vmatprep.subr.msk.mxu1 %vm345_vm0, %v5576_v15  ;;  %v204_v14 = vld [vmem:[%s5329_s3 + $0xb8] sm:$0xff] }
  0x5e   : > { %4518 = vmatmul.mubr.msk.f32.gmra.mrb[2].mxu1 %vm248_vm1, %v184_v17  ;;  %4742 = vmatmul.mubr.msk.f32.gmra.mrb[18].mxu0 %vm248_vm1, %v2087_v19  ;;  %v205_v17 = vld [vmem:[%s5329_s3 + $0xc0] sm:$0xff]  ;;  %v206_v19 = vld [vmem:[%s5329_s3 + $0xc8] sm:$0xff] }
  0x5f   : > { %4520 = vmatprep.mubr.msk.f32.mxu1 %vm248_vm1, %v185_v21  ;;  %4744 = vmatprep.mubr.msk.f32.mxu0 %vm248_vm1, %v2088_v23  ;;  %v207_v21 = vld [vmem:[%s5329_s3 + $0xd0] sm:$0xff]  ;;  %v208_v23 = vld [vmem:[%s5329_s3 + $0xd8] sm:$0xff] }
  0x62   : > { %4521 = vmatmul.mubr.msk.f32.gmra.mrb[4].mxu1 %vm248_vm1, %v186_v11  ;;  %4745 = vmatmul.mubr.msk.f32.gmra.mrb[20].mxu0 %vm248_vm1, %v2089_v25  ;;  %v210_v25 = vld [vmem:[%s5329_s3 + $0xe8] sm:$0xff] }
  0x63   : > { %4523 = vmatprep.mubr.msk.f32.mxu1 %vm248_vm1, %v187_v27  ;;  %4747 = vmatprep.mubr.msk.f32.mxu0 %vm248_vm1, %v2090_v29  ;;  %v212_v29 = vld [vmem:[%s5329_s3 + $0xf8] sm:$0xff] }
  0x66   : > { %4524 = vmatmul.mubr.msk.f32.gmra.mrb[6].mxu1 %vm248_vm1, %v188_v31  ;;  %4748 = vmatmul.mubr.msk.f32.gmra.mrb[22].mxu0 %vm248_vm1, %v2091_v33  ;;  %v899_v33 = vld [vmem:[%s5329_s3 + $0xa] sm:$0xff] }
  0x67   : > { %4526 = vmatprep.mubr.msk.f32.mxu1 %vm248_vm1, %v189_v35  ;;  %4750 = vmatprep.mubr.msk.f32.mxu0 %vm248_vm1, %v2092_v37  ;;  %v901_v37 = vld [vmem:[%s5329_s3 + $0x1a] sm:$0xff] }
  0x6a   : > { %4527 = vmatmul.mubr.msk.f32.gmra.mrb[8].mxu1 %vm248_vm1, %v190_v39  ;;  %4751 = vmatmul.mubr.msk.f32.gmra.mrb[24].mxu0 %vm248_vm1, %v2093_v41  ;;  %v5718_v41 = vld [vmem:[%s5329_s3 + $0x32] sm:$0xff] }
  0x6b   : > { %4529 = vmatprep.mubr.msk.f32.mxu1 %vm248_vm1, %v191_v43  ;;  %4753 = vmatprep.mubr.msk.f32.mxu0 %vm248_vm1, %v2094_v46  ;;  %v5730_v46 = vld [vmem:[%s5329_s3 + $0x42] sm:$0xff] }
  0x6e   : > { %4530 = vmatmul.mubr.msk.f32.gmra.mrb[10].mxu1 %vm248_vm1, %v192_v48  ;;  %4754 = vmatmul.mubr.msk.f32.gmra.mrb[26].mxu0 %vm248_vm1, %v2095_v50  ;;  %v5742_v50 = vld [vmem:[%s5329_s3 + $0x52] sm:$0xff] }
  0x6f   : > { %4532 = vmatprep.mubr.msk.f32.mxu1 %vm248_vm1, %v193_v52  ;;  %4756 = vmatprep.mubr.msk.f32.mxu0 %vm248_vm1, %v2096_v54  ;;  %v2485_v54 = vld [vmem:[%s5329_s3 + $0x100] sm:$0xff] }
  0x72   : > { %4533 = vmatmul.mubr.msk.f32.gmra.mrb[12].mxu1 %vm248_vm1, %v194_v56  ;;  %4757 = vmatmul.mubr.msk.f32.gmra.mrb[28].mxu0 %vm248_vm1, %v2097_v58  ;;  %v2486_v58 = vld [vmem:[%s5329_s3 + $0x108] sm:$0xff] }
  0x73   : > { %4535 = vmatprep.mubr.msk.f32.mxu1 %vm248_vm1, %v195_v60  ;;  %4759 = vmatprep.mubr.msk.f32.mxu0 %vm248_vm1, %v2098_v62  ;;  %v2487_v62 = vld [vmem:[%s5329_s3 + $0x110] sm:$0xff] }
  0x76   : > { %4536 = vmatmul.mubr.msk.f32.gmra.mrb[14].mxu1 %vm248_vm1, %v196_v0  ;;  %4760 = vmatmul.mubr.msk.f32.gmra.mrb[30].mxu0 %vm248_vm1, %v2099_v3  ;;  %v2488_v3 = vld [vmem:[%s5329_s3 + $0x118] sm:$0xff] }
  0x77   : > { %4538 = vmatprep.mubr.msk.f32.mxu1 %vm248_vm1, %v197_v5  ;;  %4764 = vmatprep.mubr.msk.f32.mxu0 %vm248_vm1, %v186_v11  ;;  %v209_v11 = vld [vmem:[%s5329_s3 + $0xe0] sm:$0xff] }
  0x7a   : > { %4539 = vmatmul.mubr.msk.f32.gmra.mrb[16].mxu1 %vm248_vm1, %v198_v7  ;;  %4765 = vmatmul.mubr.msk.f32.vlgmr.msra.gmra.mrb[0].mxu0 %vm248_vm1, %v187_v27  ;;  %v211_v27 = vld [vmem:[%s5329_s3 + $0xf0] sm:$0xff] }
  0x7b   : > { %4813 = vmatpush3.msk.msra.mxu0 %vm345_vm0, %v5462_v44  ;;  %4541 = vmatprep.mubr.msk.f32.mxu1 %vm248_vm1, %v199_v8  ;;  %v202_v44 = vld [vmem:[%s5329_s3 + $0xa8] sm:$0xff] }
  0x7c   : > { %4767 = vmatprep.mubr.msk.f32.mxu0 %vm248_vm1, %v188_v31  ;;  %4862 = vmatprep.subr.msk.mxu0 %vm345_vm0, %v5646_v9  ;;  %v898_v31 = vld [vmem:[%s5329_s3 + $0x2] sm:$0xff] }
  0x7e   : > { %4542 = vmatmul.mubr.msk.f32.gmra.mrb[18].mxu1 %vm248_vm1, %v200_v10  ;;  %4768 = vmatmul.mubr.msk.f32.gmra.mrb[2].mxu0 %vm248_vm1, %v189_v35  ;;  %v900_v35 = vld [vmem:[%s5329_s3 + $0x12] sm:$0xff] }
  0x7f   : > { %4544 = vmatprep.mubr.msk.f32.mxu1 %vm248_vm1, %v201_v12  ;;  %4770 = vmatprep.mubr.msk.f32.mxu0 %vm248_vm1, %v190_v39  ;;  %v902_v39 = vld [vmem:[%s5329_s3 + $0x22] sm:$0xff] }
  0x82   : > { %4545 = vmatmul.mubr.msk.f32.gmra.mrb[20].mxu1 %vm248_vm1, %v202_v44  ;;  %4771 = vmatmul.mubr.msk.f32.gmra.mrb[4].mxu0 %vm248_vm1, %v191_v43  ;;  %v5727_v43 = vld [vmem:[%s5329_s3 + $0x3a] sm:$0xff] }
  0x83   : > { %4547 = vmatprep.mubr.msk.f32.mxu1 %vm248_vm1, %v203_v13  ;;  %4773 = vmatprep.mubr.msk.f32.mxu0 %vm248_vm1, %v192_v48  ;;  %v5739_v48 = vld [vmem:[%s5329_s3 + $0x4a] sm:$0xff] }
  0x86   : > { %4548 = vmatmul.mubr.msk.f32.gmra.mrb[22].mxu1 %vm248_vm1, %v204_v14  ;;  %4774 = vmatmul.mubr.msk.f32.gmra.mrb[6].mxu0 %vm248_vm1, %v193_v52  ;;  %v5751_v52 = vld [vmem:[%s5329_s3 + $0x5a] sm:$0xff] }
  0x87   : > { %4550 = vmatprep.mubr.msk.f32.mxu1 %vm248_vm1, %v205_v17  ;;  %4776 = vmatprep.mubr.msk.f32.mxu0 %vm248_vm1, %v194_v56  ;;  %v5755_v56 = vld [vmem:[%s5329_s3 + $0x62] sm:$0xff] }
  0x8a   : > { %4551 = vmatmul.mubr.msk.f32.gmra.mrb[24].mxu1 %vm248_vm1, %v206_v19  ;;  %4777 = vmatmul.mubr.msk.f32.gmra.mrb[8].mxu0 %vm248_vm1, %v195_v60  ;;  %v5765_v60 = vld [vmem:[%s5329_s3 + $0x6a] sm:$0xff] }
  0x8b   : > { %4553 = vmatprep.mubr.msk.f32.mxu1 %vm248_vm1, %v207_v21  ;;  %4779 = vmatprep.mubr.msk.f32.mxu0 %vm248_vm1, %v196_v0  ;;  %v5769_v0 = vld [vmem:[%s5329_s3 + $0x72] sm:$0xff] }
  0x8e   : > { %4554 = vmatmul.mubr.msk.f32.gmra.mrb[26].mxu1 %vm248_vm1, %v208_v23  ;;  %4780 = vmatmul.mubr.msk.f32.gmra.mrb[10].mxu0 %vm248_vm1, %v197_v5  ;;  %v5779_v5 = vld [vmem:[%s5329_s3 + $0x7a] sm:$0xff] }
  0x8f   : > { %4556 = vmatprep.mubr.msk.f32.mxu1 %vm248_vm1, %v209_v11  ;;  %4782 = vmatprep.mubr.msk.f32.mxu0 %vm248_vm1, %v198_v7  ;;  %v2489_v7 = vld [vmem:[%s5329_s3 + $0x120] sm:$0xff] }
  0x92   : > { %4557 = vmatmul.mubr.msk.f32.gmra.mrb[28].mxu1 %vm248_vm1, %v210_v25  ;;  %4783 = vmatmul.mubr.msk.f32.gmra.mrb[12].mxu0 %vm248_vm1, %v199_v8  ;;  %v5783_v8 = vld [vmem:[%s5329_s3 + $0x82] sm:$0xff] }
  0x93   : > { %4559 = vmatprep.mubr.msk.f32.mxu1 %vm248_vm1, %v211_v27  ;;  %4785 = vmatprep.mubr.msk.f32.mxu0 %vm248_vm1, %v200_v10  ;;  %v5793_v10 = vld [vmem:[%s5329_s3 + $0x8a] sm:$0xff] }
  0x96   : > { %4560 = vmatmul.mubr.msk.f32.gmra.mrb[30].mxu1 %vm248_vm1, %v212_v29  ;;  %4786 = vmatmul.mubr.msk.f32.gmra.mrb[14].mxu0 %vm248_vm1, %v201_v12  ;;  %v5796_v12 = vld [vmem:[%s5329_s3 + $0x92] sm:$0xff] }
  0x97   : > { %4564 = vmatprep.mubr.msk.f32.mxu1 %vm248_vm1, %v898_v31  ;;  %4788 = vmatprep.mubr.msk.f32.mxu0 %vm248_vm1, %v202_v44  ;;  %v5807_v44 = vld [vmem:[%s5329_s3 + $0x9a] sm:$0xff]  ;;  %v1310_v31 = vld [vmem:[%s5329_s3 + $0xc4] sm:$0xff] }
  0x9a   : > { %4565 = vmatmul.mubr.msk.f32.vlgmr.msra.gmra.mrb[0].mxu1 %vm248_vm1, %v899_v33  ;;  %4789 = vmatmul.mubr.msk.f32.gmra.mrb[16].mxu0 %vm248_vm1, %v203_v13  ;;  %v2877_v13 = vld [vmem:[%s5329_s3 + $0x111] sm:$0xff] }
  0x9b   : > { %4613 = vmatpush3.msk.msra.mxu1 %vm345_vm0, %v5576_v15  ;;  %4567 = vmatprep.mubr.msk.f32.mxu1 %vm248_vm1, %v900_v35  ;;  %v5715_v15 = vld [vmem:[%s5329_s3 + $0x2a] sm:$0xff]  ;;  %v1312_v35 = vld [vmem:[%s5329_s3 + $0xd4] sm:$0xff] }
  0x9c   : > { %4791 = vmatprep.mubr.msk.f32.mxu0 %vm248_vm1, %v204_v14  ;;  %4912 = vmatprep.subr.msk.mxu1 %vm345_vm0, %v5305_v1  ;;  %v2878_v14 = vld [vmem:[%s5329_s3 + $0x119] sm:$0xff]  ;;  %v1311_v33 = vld [vmem:[%s5329_s3 + $0xcc] sm:$0xff] }
  0x9e   : > { %4568 = vmatmul.mubr.msk.f32.gmra.mrb[2].mxu1 %vm248_vm1, %v901_v37  ;;  %4792 = vmatmul.mubr.msk.f32.gmra.mrb[18].mxu0 %vm248_vm1, %v205_v17  ;;  %v1303_v17 = vld [vmem:[%s5329_s3 + $0x8c] sm:$0xff]  ;;  %v1313_v37 = vld [vmem:[%s5329_s3 + $0xdc] sm:$0xff] }
  0x9f   : > { %4570 = vmatprep.mubr.msk.f32.mxu1 %vm248_vm1, %v902_v39  ;;  %4794 = vmatprep.mubr.msk.f32.mxu0 %vm248_vm1, %v206_v19  ;;  %v2879_v19 = vld [vmem:[%s5329_s3 + $0x121] sm:$0xff] }
  0xa0   : > { %v1314_v39 = vld [vmem:[%s5329_s3 + $0xe4] sm:$0xff] }
  0xa2   : > { %4571 = vmatmul.mubr.msk.f32.gmra.mrb[4].mxu1 %vm248_vm1, %v5715_v15  ;;  %4795 = vmatmul.mubr.msk.f32.gmra.mrb[20].mxu0 %vm248_vm1, %v207_v21  ;;  %v1304_v21 = vld [vmem:[%s5329_s3 + $0x94] sm:$0xff] }
  0xa3   : > { %4573 = vmatprep.mubr.msk.f32.mxu1 %vm248_vm1, %v5718_v41  ;;  %4797 = vmatprep.mubr.msk.f32.mxu0 %vm248_vm1, %v208_v23  ;;  %v1305_v23 = vld [vmem:[%s5329_s3 + $0x9c] sm:$0xff] }
  0xa6   : > { %4574 = vmatmul.mubr.msk.f32.gmra.mrb[6].mxu1 %vm248_vm1, %v5727_v43  ;;  %4798 = vmatmul.mubr.msk.f32.gmra.mrb[22].mxu0 %vm248_vm1, %v209_v11  ;;  %v1306_v11 = vld [vmem:[%s5329_s3 + $0xa4] sm:$0xff] }
  0xa7   : > { %4576 = vmatprep.mubr.msk.f32.mxu1 %vm248_vm1, %v5730_v46  ;;  %4800 = vmatprep.mubr.msk.f32.mxu0 %vm248_vm1, %v210_v25  ;;  %v1307_v25 = vld [vmem:[%s5329_s3 + $0xac] sm:$0xff] }
  0xaa   : > { %4577 = vmatmul.mubr.msk.f32.gmra.mrb[8].mxu1 %vm248_vm1, %v5739_v48  ;;  %4801 = vmatmul.mubr.msk.f32.gmra.mrb[24].mxu0 %vm248_vm1, %v211_v27  ;;  %v1308_v27 = vld [vmem:[%s5329_s3 + $0xb4] sm:$0xff] }
  0xab   : > { %4579 = vmatprep.mubr.msk.f32.mxu1 %vm248_vm1, %v5742_v50  ;;  %4803 = vmatprep.mubr.msk.f32.mxu0 %vm248_vm1, %v212_v29  ;;  %v1309_v29 = vld [vmem:[%s5329_s3 + $0xbc] sm:$0xff] }
  0xae   : > { %4580 = vmatmul.mubr.msk.f32.gmra.mrb[10].mxu1 %vm248_vm1, %v5751_v52  ;;  %4804 = vmatmul.mubr.msk.f32.gmra.mrb[26].mxu0 %vm248_vm1, %v2485_v54  ;;  %v1696_v54 = vld [vmem:[%s5329_s3 + $0xa5] sm:$0xff] }
  0xaf   : > { %4582 = vmatprep.mubr.msk.f32.mxu1 %vm248_vm1, %v5755_v56  ;;  %4806 = vmatprep.mubr.msk.f32.mxu0 %vm248_vm1, %v2486_v58  ;;  %v1698_v58 = vld [vmem:[%s5329_s3 + $0xb5] sm:$0xff] }
  0xb2   : > { %4583 = vmatmul.mubr.msk.f32.gmra.mrb[12].mxu1 %vm248_vm1, %v5765_v60  ;;  %4807 = vmatmul.mubr.msk.f32.gmra.mrb[28].mxu0 %vm248_vm1, %v2487_v62  ;;  %v1700_v62 = vld [vmem:[%s5329_s3 + $0xc5] sm:$0xff] }
  0xb3   : > { %4585 = vmatprep.mubr.msk.f32.mxu1 %vm248_vm1, %v5769_v0  ;;  %4809 = vmatprep.mubr.msk.f32.mxu0 %vm248_vm1, %v2488_v3  ;;  %v1702_v3 = vld [vmem:[%s5329_s3 + $0xd5] sm:$0xff] }
  0xb6   : > { %4586 = vmatmul.mubr.msk.f32.gmra.mrb[14].mxu1 %vm248_vm1, %v5779_v5  ;;  %4810 = vmatmul.mubr.msk.f32.gmra.mrb[30].mxu0 %vm248_vm1, %v2489_v7  ;;  %v1704_v7 = vld [vmem:[%s5329_s3 + $0xe5] sm:$0xff] }
  0xb7   : > { %4588 = vmatprep.mubr.msk.f32.mxu1 %vm248_vm1, %v5783_v8  ;;  %4814 = vmatprep.mubr.msk.f32.mxu0 %vm248_vm1, %v5368_v16  ;;  %v5812_v16 = vld [vmem:[%s5329_s3 + $0xa2] sm:$0xff] }
  0xba   : > { %4589 = vmatmul.mubr.msk.f32.gmra.mrb[16].mxu1 %vm248_vm1, %v5793_v10  ;;  %4815 = vmatmul.mubr.msk.f32.vlgmr.msra.gmra.mrb[0].mxu0 %vm248_vm1, %v5372_v18  ;;  %v5823_v18 = vld [vmem:[%s5329_s3 + $0xaa] sm:$0xff] }
  0xbb   : > { %4863 = vmatpush3.msk.msra.mxu0 %vm345_vm0, %v5646_v9  ;;  %4591 = vmatprep.mubr.msk.f32.mxu1 %vm248_vm1, %v5796_v12  ;;  %v5826_v9 = vld [vmem:[%s5329_s3 + $0xb2] sm:$0xff] }
  0xbc   : > { %4817 = vmatprep.mubr.msk.f32.mxu0 %vm248_vm1, %v5382_v20  ;;  %v5837_v20 = vld [vmem:[%s5329_s3 + $0xba] sm:$0xff] }
  0xbe   : > { %4592 = vmatmul.mubr.msk.f32.gmra.mrb[18].mxu1 %vm248_vm1, %v5807_v44  ;;  %4818 = vmatmul.mubr.msk.f32.gmra.mrb[2].mxu0 %vm248_vm1, %v5386_v22  ;;  %v5840_v22 = vld [vmem:[%s5329_s3 + $0xc2] sm:$0xff] }
  0xbf   : > { %4594 = vmatprep.mubr.msk.f32.mxu1 %vm248_vm1, %v5812_v16  ;;  %4820 = vmatprep.mubr.msk.f32.mxu0 %vm248_vm1, %v5396_v24  ;;  %v5851_v24 = vld [vmem:[%s5329_s3 + $0xca] sm:$0xff] }
  0xc2   : > { %4595 = vmatmul.mubr.msk.f32.gmra.mrb[20].mxu1 %vm248_vm1, %v5823_v18  ;;  %4821 = vmatmul.mubr.msk.f32.gmra.mrb[4].mxu0 %vm248_vm1, %v5400_v26  ;;  %v5854_v26 = vld [vmem:[%s5329_s3 + $0xd2] sm:$0xff] }
  0xc3   : > { %4597 = vmatprep.mubr.msk.f32.mxu1 %vm248_vm1, %v5826_v9  ;;  %4823 = vmatprep.mubr.msk.f32.mxu0 %vm248_vm1, %v5410_v28  ;;  %v5865_v28 = vld [vmem:[%s5329_s3 + $0xda] sm:$0xff] }
  0xc6   : > { %4598 = vmatmul.mubr.msk.f32.gmra.mrb[22].mxu1 %vm248_vm1, %v5837_v20  ;;  %4824 = vmatmul.mubr.msk.f32.gmra.mrb[6].mxu0 %vm248_vm1, %v5414_v30  ;;  %v5868_v30 = vld [vmem:[%s5329_s3 + $0xe2] sm:$0xff] }
  0xc7   : > { %4600 = vmatprep.mubr.msk.f32.mxu1 %vm248_vm1, %v5840_v22  ;;  %4826 = vmatprep.mubr.msk.f32.mxu0 %vm248_vm1, %v5424_v32  ;;  %v5879_v32 = vld [vmem:[%s5329_s3 + $0xea] sm:$0xff] }
  0xca   : > { %4601 = vmatmul.mubr.msk.f32.gmra.mrb[24].mxu1 %vm248_vm1, %v5851_v24  ;;  %4827 = vmatmul.mubr.msk.f32.gmra.mrb[8].mxu0 %vm248_vm1, %v5428_v34  ;;  %v5882_v34 = vld [vmem:[%s5329_s3 + $0xf2] sm:$0xff] }
  0xcb   : > { %4603 = vmatprep.mubr.msk.f32.mxu1 %vm248_vm1, %v5854_v26  ;;  %4829 = vmatprep.mubr.msk.f32.mxu0 %vm248_vm1, %v5438_v36  ;;  %v5893_v36 = vld [vmem:[%s5329_s3 + $0xfa] sm:$0xff] }
  0xce   : > { %4604 = vmatmul.mubr.msk.f32.gmra.mrb[26].mxu1 %vm248_vm1, %v5865_v28  ;;  %4830 = vmatmul.mubr.msk.f32.gmra.mrb[10].mxu0 %vm248_vm1, %v5442_v38  ;;  %v1288_v38 = vld [vmem:[%s5329_s3 + $0x14] sm:$0xff] }
  0xcf   : > { %4606 = vmatprep.mubr.msk.f32.mxu1 %vm248_vm1, %v5868_v30  ;;  %4832 = vmatprep.mubr.msk.f32.mxu0 %vm248_vm1, %v5452_v40  ;;  %v1289_v40 = vld [vmem:[%s5329_s3 + $0x1c] sm:$0xff] }
  0xd2   : > { %4607 = vmatmul.mubr.msk.f32.gmra.mrb[28].mxu1 %vm248_vm1, %v5879_v32  ;;  %4833 = vmatmul.mubr.msk.f32.gmra.mrb[12].mxu0 %vm248_vm1, %v5456_v42  ;;  %v1290_v42 = vld [vmem:[%s5329_s3 + $0x24] sm:$0xff] }
  0xd3   : > { %4609 = vmatprep.mubr.msk.f32.mxu1 %vm248_vm1, %v5882_v34  ;;  %4835 = vmatprep.mubr.msk.f32.mxu0 %vm248_vm1, %v5472_v45  ;;  %v1291_v45 = vld [vmem:[%s5329_s3 + $0x2c] sm:$0xff] }
  0xd6   : > { %4610 = vmatmul.mubr.msk.f32.gmra.mrb[30].mxu1 %vm248_vm1, %v5893_v36  ;;  %4836 = vmatmul.mubr.msk.f32.gmra.mrb[14].mxu0 %vm248_vm1, %v5477_v47  ;;  %v1292_v47 = vld [vmem:[%s5329_s3 + $0x34] sm:$0xff] }
  0xd7   : > { %4614 = vmatprep.mubr.msk.f32.mxu1 %vm248_vm1, %v1288_v38  ;;  %4838 = vmatprep.mubr.msk.f32.mxu0 %vm248_vm1, %v5489_v49  ;;  %v1294_v49 = vld [vmem:[%s5329_s3 + $0x44] sm:$0xff] }
  0xda   : > { %4615 = vmatmul.mubr.msk.f32.vlgmr.msra.gmra.mrb[0].mxu1 %vm248_vm1, %v1289_v40  ;;  %4839 = vmatmul.mubr.msk.f32.gmra.mrb[16].mxu0 %vm248_vm1, %v5493_v51  ;;  %v1295_v51 = vld [vmem:[%s5329_s3 + $0x4c] sm:$0xff] }
  0xdb   : > { %4913 = vmatpush3.msk.msra.mxu1 %vm345_vm0, %v5305_v1  ;;  %4617 = vmatprep.mubr.msk.f32.mxu1 %vm248_vm1, %v1290_v42  ;;  %v1293_v1 = vld [vmem:[%s5329_s3 + $0x3c] sm:$0xff] }
  0xdc   : > { %4841 = vmatprep.mubr.msk.f32.mxu0 %vm248_vm1, %v5503_v53  ;;  %v1296_v53 = vld [vmem:[%s5329_s3 + $0x54] sm:$0xff] }
  0xde   : > { %4618 = vmatmul.mubr.msk.f32.gmra.mrb[2].mxu1 %vm248_vm1, %v1291_v45  ;;  %4842 = vmatmul.mubr.msk.f32.gmra.mrb[18].mxu0 %vm248_vm1, %v5507_v55  ;;  %v1297_v55 = vld [vmem:[%s5329_s3 + $0x5c] sm:$0xff] }
  0xdf   : > { %4620 = vmatprep.mubr.msk.f32.mxu1 %vm248_vm1, %v1292_v47  ;;  %4844 = vmatprep.mubr.msk.f32.mxu0 %vm248_vm1, %v5517_v57  ;;  %v1298_v57 = vld [vmem:[%s5329_s3 + $0x64] sm:$0xff] }
  0xe2   : > { %4621 = vmatmul.mubr.msk.f32.gmra.mrb[4].mxu1 %vm248_vm1, %v1293_v1  ;;  %4845 = vmatmul.mubr.msk.f32.gmra.mrb[20].mxu0 %vm248_vm1, %v5521_v59  ;;  %v1299_v59 = vld [vmem:[%s5329_s3 + $0x6c] sm:$0xff] }
  0xe3   : > { %4623 = vmatprep.mubr.msk.f32.mxu1 %vm248_vm1, %v1294_v49  ;;  %4847 = vmatprep.mubr.msk.f32.mxu0 %vm248_vm1, %v5531_v61  ;;  %v2875_v61 = vld [vmem:[%s5329_s3 + $0x101] sm:$0xff] }
  0xe6   : > { %4624 = vmatmul.mubr.msk.f32.gmra.mrb[6].mxu1 %vm248_vm1, %v1295_v51  ;;  %4848 = vmatmul.mubr.msk.f32.gmra.mrb[22].mxu0 %vm248_vm1, %v5535_v63  ;;  %v1300_v63 = vld [vmem:[%s5329_s3 + $0x74] sm:$0xff] }
  0xe7   : > { %4626 = vmatprep.mubr.msk.f32.mxu1 %vm248_vm1, %v1296_v53  ;;  %4850 = vmatprep.mubr.msk.f32.mxu0 %vm248_vm1, %v5545_v2  ;;  %v2876_v2 = vld [vmem:[%s5329_s3 + $0x109] sm:$0xff] }
  0xea   : > { %4627 = vmatmul.mubr.msk.f32.gmra.mrb[8].mxu1 %vm248_vm1, %v1297_v55  ;;  %4851 = vmatmul.mubr.msk.f32.gmra.mrb[24].mxu0 %vm248_vm1, %v5549_v4  ;;  %v1301_v4 = vld [vmem:[%s5329_s3 + $0x7c] sm:$0xff] }
  0xeb   : > { %4629 = vmatprep.mubr.msk.f32.mxu1 %vm248_vm1, %v1298_v57  ;;  %4853 = vmatprep.mubr.msk.f32.mxu0 %vm248_vm1, %v5559_v6  ;;  %v1302_v6 = vld [vmem:[%s5329_s3 + $0x84] sm:$0xff] }
  0xee   : > { %4630 = vmatmul.mubr.msk.f32.gmra.mrb[10].mxu1 %vm248_vm1, %v1299_v59  ;;  %4854 = vmatmul.mubr.msk.f32.gmra.mrb[26].mxu0 %vm248_vm1, %v2875_v61 }
  0xef   : > { %4632 = vmatprep.mubr.msk.f32.mxu1 %vm248_vm1, %v1300_v63  ;;  %4856 = vmatprep.mubr.msk.f32.mxu0 %vm248_vm1, %v2876_v2 }
  0xf2   : > { %4633 = vmatmul.mubr.msk.f32.gmra.mrb[12].mxu1 %vm248_vm1, %v1301_v4  ;;  %4857 = vmatmul.mubr.msk.f32.gmra.mrb[28].mxu0 %vm248_vm1, %v2877_v13 }
  0xf3   : > { %4635 = vmatprep.mubr.msk.f32.mxu1 %vm248_vm1, %v1302_v6  ;;  %4859 = vmatprep.mubr.msk.f32.mxu0 %vm248_vm1, %v2878_v14 }
  0xf6   : > { %4636 = vmatmul.mubr.msk.f32.gmra.mrb[14].mxu1 %vm248_vm1, %v1303_v17  ;;  %4860 = vmatmul.mubr.msk.f32.gmra.mrb[30].mxu0 %vm248_vm1, %v2879_v19 }
  0xf7   : > { %4638 = vmatprep.mubr.msk.f32.mxu1 %vm248_vm1, %v1304_v21  ;;  %4864 = vmatprep.mubr.msk.f32.mxu0 %vm248_vm1, %v5715_v15  ;;  %v1315_v15 = vld [vmem:[%s5329_s3 + $0xec] sm:$0xff] }
  0xfa   : > { %4639 = vmatmul.mubr.msk.f32.gmra.mrb[16].mxu1 %vm248_vm1, %v1305_v23  ;;  %4865 = vmatmul.mubr.msk.f32.vlgmr.msra.gmra.mrb[0].mxu0 %vm248_vm1, %v5718_v41  ;;  %v1316_v41 = vld [vmem:[%s5329_s3 + $0xf4] sm:$0xff] }
  0xfb   : > { %4641 = vmatprep.mubr.msk.f32.mxu1 %vm248_vm1, %v1306_v11  ;;  %4867 = vmatprep.mubr.msk.f32.mxu0 %vm248_vm1, %v5727_v43  ;;  %v1317_v43 = vld [vmem:[%s5329_s3 + $0xfc] sm:$0xff] }
  0xfe   : > { %4642 = vmatmul.mubr.msk.f32.gmra.mrb[18].mxu1 %vm248_vm1, %v1307_v25  ;;  %4868 = vmatmul.mubr.msk.f32.gmra.mrb[2].mxu0 %vm248_vm1, %v5730_v46  ;;  %v1318_v46 = vld [vmem:[%s5329_s3 + $0x104] sm:$0xff] }
  0xff   : > { %4644 = vmatprep.mubr.msk.f32.mxu1 %vm248_vm1, %v1308_v27  ;;  %4870 = vmatprep.mubr.msk.f32.mxu0 %vm248_vm1, %v5739_v48  ;;  %v1319_v48 = vld [vmem:[%s5329_s3 + $0x10c] sm:$0xff] }
 0x102   : > { %4645 = vmatmul.mubr.msk.f32.gmra.mrb[20].mxu1 %vm248_vm1, %v1309_v29  ;;  %4871 = vmatmul.mubr.msk.f32.gmra.mrb[4].mxu0 %vm248_vm1, %v5742_v50  ;;  %v1694_v50 = vld [vmem:[%s5329_s3 + $0x95] sm:$0xff] }
 0x103   : > { %4647 = vmatprep.mubr.msk.f32.mxu1 %vm248_vm1, %v1310_v31  ;;  %4873 = vmatprep.mubr.msk.f32.mxu0 %vm248_vm1, %v5751_v52  ;;  %v1695_v52 = vld [vmem:[%s5329_s3 + $0x9d] sm:$0xff] }
 0x106   : > { %4648 = vmatmul.mubr.msk.f32.gmra.mrb[22].mxu1 %vm248_vm1, %v1311_v33  ;;  %4874 = vmatmul.mubr.msk.f32.gmra.mrb[6].mxu0 %vm248_vm1, %v5755_v56  ;;  %v1697_v56 = vld [vmem:[%s5329_s3 + $0xad] sm:$0xff] }
 0x107   : > { %4650 = vmatprep.mubr.msk.f32.mxu1 %vm248_vm1, %v1312_v35  ;;  %4876 = vmatprep.mubr.msk.f32.mxu0 %vm248_vm1, %v5765_v60  ;;  %v1699_v60 = vld [vmem:[%s5329_s3 + $0xbd] sm:$0xff] }
 0x10a   : > { %4651 = vmatmul.mubr.msk.f32.gmra.mrb[24].mxu1 %vm248_vm1, %v1313_v37  ;;  %4877 = vmatmul.mubr.msk.f32.gmra.mrb[8].mxu0 %vm248_vm1, %v5769_v0  ;;  %v1701_v0 = vld [vmem:[%s5329_s3 + $0xcd] sm:$0xff] }
 0x10b   : > { %4653 = vmatprep.mubr.msk.f32.mxu1 %vm248_vm1, %v1314_v39  ;;  %4879 = vmatprep.mubr.msk.f32.mxu0 %vm248_vm1, %v5779_v5  ;;  %v1703_v5 = vld [vmem:[%s5329_s3 + $0xdd] sm:$0xff] }
 0x10e   : > { %4654 = vmatmul.mubr.msk.f32.gmra.mrb[26].mxu1 %vm248_vm1, %v1315_v15  ;;  %4880 = vmatmul.mubr.msk.f32.gmra.mrb[10].mxu0 %vm248_vm1, %v5783_v8  ;;  %v1705_v8 = vld [vmem:[%s5329_s3 + $0xed] sm:$0xff] }
 0x10f   : > { %4656 = vmatprep.mubr.msk.f32.mxu1 %vm248_vm1, %v1316_v41  ;;  %4882 = vmatprep.mubr.msk.f32.mxu0 %vm248_vm1, %v5793_v10  ;;  %v3265_v10 = vld [vmem:[%s5329_s3 + $0x102] sm:$0xff] }
 0x112   : > { %4657 = vmatmul.mubr.msk.f32.gmra.mrb[28].mxu1 %vm248_vm1, %v1317_v43  ;;  %4883 = vmatmul.mubr.msk.f32.gmra.mrb[12].mxu0 %vm248_vm1, %v5796_v12  ;;  %v1706_v12 = vld [vmem:[%s5329_s3 + $0xf5] sm:$0xff] }
 0x113   : > { %4659 = vmatprep.mubr.msk.f32.mxu1 %vm248_vm1, %v1318_v46  ;;  %4885 = vmatprep.mubr.msk.f32.mxu0 %vm248_vm1, %v5807_v44  ;;  %v3266_v44 = vld [vmem:[%s5329_s3 + $0x10a] sm:$0xff] }
 0x116   : > { %4660 = vmatmul.mubr.msk.f32.gmra.mrb[30].mxu1 %vm248_vm1, %v1319_v48  ;;  %4886 = vmatmul.mubr.msk.f32.gmra.mrb[14].mxu0 %vm248_vm1, %v5812_v16  ;;  %v1707_v16 = vld [vmem:[%s5329_s3 + $0xfd] sm:$0xff] }
 0x117   : > { %4688 = vmatprep.mubr.msk.f32.mxu1 %vm248_vm1, %v1694_v50  ;;  %4888 = vmatprep.mubr.msk.f32.mxu0 %vm248_vm1, %v5823_v18  ;;  %v3267_v18 = vld [vmem:[%s5329_s3 + $0x112] sm:$0xff] }
 0x11a   : > { %4689 = vmatmul.mubr.msk.f32.vlgmr.msra.gmra.mrb[16].mxu1 %vm248_vm1, %v1695_v52  ;;  %4889 = vmatmul.mubr.msk.f32.gmra.mrb[16].mxu0 %vm248_vm1, %v5826_v9  ;;  %v1708_v9 = vld [vmem:[%s5329_s3 + $0x105] sm:$0xff] }
 0x11b   : > { %4691 = vmatprep.mubr.msk.f32.mxu1 %vm248_vm1, %v1696_v54  ;;  %4891 = vmatprep.mubr.msk.f32.mxu0 %vm248_vm1, %v5837_v20  ;;  %v3268_v20 = vld [vmem:[%s5329_s3 + $0x11a] sm:$0xff] }
 0x11e   : > { %4692 = vmatmul.mubr.msk.f32.gmra.mrb[18].mxu1 %vm248_vm1, %v1697_v56  ;;  %4892 = vmatmul.mubr.msk.f32.gmra.mrb[18].mxu0 %vm248_vm1, %v5840_v22  ;;  %v1709_v22 = vld [vmem:[%s5329_s3 + $0x10d] sm:$0xff] }
 0x11f   : > { %4694 = vmatprep.mubr.msk.f32.mxu1 %vm248_vm1, %v1698_v58  ;;  %4894 = vmatprep.mubr.msk.f32.mxu0 %vm248_vm1, %v5851_v24  ;;  %v3269_v24 = vld [vmem:[%s5329_s3 + $0x122] sm:$0xff] }
 0x122   : > { %4695 = vmatmul.mubr.msk.f32.gmra.mrb[20].mxu1 %vm248_vm1, %v1699_v60  ;;  %4895 = vmatmul.mubr.msk.f32.gmra.mrb[20].mxu0 %vm248_vm1, %v5854_v26 }
 0x123   : > { %4697 = vmatprep.mubr.msk.f32.mxu1 %vm248_vm1, %v1700_v62  ;;  %4897 = vmatprep.mubr.msk.f32.mxu0 %vm248_vm1, %v5865_v28 }
 0x126   : > { %4698 = vmatmul.mubr.msk.f32.gmra.mrb[22].mxu1 %vm248_vm1, %v1701_v0  ;;  %4898 = vmatmul.mubr.msk.f32.gmra.mrb[22].mxu0 %vm248_vm1, %v5868_v30 }
 0x127   : > { %4700 = vmatprep.mubr.msk.f32.mxu1 %vm248_vm1, %v1702_v3  ;;  %4900 = vmatprep.mubr.msk.f32.mxu0 %vm248_vm1, %v5879_v32 }
 0x12a   : > { %4701 = vmatmul.mubr.msk.f32.gmra.mrb[24].mxu1 %vm248_vm1, %v1703_v5  ;;  %4901 = vmatmul.mubr.msk.f32.gmra.mrb[24].mxu0 %vm248_vm1, %v5882_v34 }
 0x12b   : > { %4703 = vmatprep.mubr.msk.f32.mxu1 %vm248_vm1, %v1704_v7  ;;  %4903 = vmatprep.mubr.msk.f32.mxu0 %vm248_vm1, %v5893_v36 }
 0x12e   : > { %4704 = vmatmul.mubr.msk.f32.gmra.mrb[26].mxu1 %vm248_vm1, %v1705_v8  ;;  %4904 = vmatmul.mubr.msk.f32.gmra.mrb[26].mxu0 %vm248_vm1, %v3265_v10 }
 0x12f   : > { %4706 = vmatprep.mubr.msk.f32.mxu1 %vm248_vm1, %v1706_v12  ;;  %4906 = vmatprep.mubr.msk.f32.mxu0 %vm248_vm1, %v3266_v44 }
 0x132   : > { %4707 = vmatmul.mubr.msk.f32.gmra.mrb[28].mxu1 %vm248_vm1, %v1707_v16  ;;  %4907 = vmatmul.mubr.msk.f32.gmra.mrb[28].mxu0 %vm248_vm1, %v3267_v18 }
 0x133   : > { %4709 = vmatprep.mubr.msk.f32.mxu1 %vm248_vm1, %v1708_v9  ;;  %4909 = vmatprep.mubr.msk.f32.mxu0 %vm248_vm1, %v3268_v20 }
 0x136   : > { %4710 = vmatmul.mubr.msk.f32.gmra.mrb[30].mxu1 %vm248_vm1, %v1709_v22  ;;  %4910 = vmatmul.mubr.msk.f32.gmra.mrb[30].mxu0 %vm248_vm1, %v3269_v24 }
 0x1ad   : > { %v4616_v26 = vpop.f32.mrb[0].mxu1 }
 0x1ae   : > { %v1487_v28 = vpop.f32.mrb[1].mxu1 }
 0x1b1   : > { %v4619_v30 = vpop.f32.mrb[2].mxu1 }
 0x1b2   : > { %v1497_v32 = vpop.f32.mrb[3].mxu1 }
 0x1b5   : > { %v4622_v34 = vpop.f32.mrb[4].mxu1 }
 0x1b6   : > { %v1507_v36 = vpop.f32.mrb[5].mxu1 }
 0x1b9   : > { %v4625_v38 = vpop.f32.mrb[6].mxu1 }
 0x1ba   : > { %v1517_v40 = vpop.f32.mrb[7].mxu1 }
 0x1bd   : > { %v4628_v42 = vpop.f32.mrb[8].mxu1 }
 0x1be   : > { %v6093_v45 = vpop.f32.mrb[9].mxu1 }
 0x1c1   : > { %v6096_v47 = vpop.f32.mrb[10].mxu1 }
 0x1c2   : > { %v6098_v1 = vpop.f32.mrb[11].mxu1 }
 0x1c5   : > { %v6100_v49 = vpop.f32.mrb[12].mxu1 }
 0x1c6   : > { %v6102_v51 = vpop.f32.mrb[13].mxu1 }
 0x1c9   : > { %v6105_v53 = vpop.f32.mrb[14].mxu1 }
 0x1ca   : > { %v6107_v55 = vpop.f32.mrb[15].mxu1 }
 0x1cd   : > { %v4866_v57 = vpop.f32.mrb[0].mxu0 }
 0x1ce   : > { %v4914_v59 = vadd.f32 %v4866_v57, %v4616_v26  ;;  %v3437_v61 = vpop.f32.mrb[1].mxu0 }
 0x1cf   : > { %v4915_v63 = vadd.f32 %v3437_v61, %v1487_v28 }
 0x1d0   : > { %vm3629_vm2 = vcmp.gt.f32.partialorder %v4914_v59, 0.0  ;;  %v3661_v2 = vmul.f32 5.398, %v4914_v59 }
 0x1d1   : > { %vm3628_vm3 = vcmp.gt.f32.partialorder %v4915_v63, 0.0  ;;  %v3660_v4 = vmul.f32 5.398, %v4915_v63  ;;  %v4869_v13 = vpop.f32.mrb[2].mxu0 }
 0x1d2   : > { %v3693_v6 = vsel %vm3629_vm2, %v4914_v59, %v3661_v2  ;;  %v4916_v14 = vadd.f32 %v4869_v13, %v4619_v30  ;;  %v3447_v17 = vpop.f32.mrb[3].mxu0 }
 0x1d3   : > { %3725 = vst [vmem:[%s6112_s26 + $0x8] sm:$0xff] %v3693_v6  ;;  %v3692_v19 = vsel %vm3628_vm3, %v4915_v63, %v3660_v4  ;;  %v4917_v21 = vadd.f32 %v3447_v17, %v1497_v32 }
 0x1d4   : > { %3724 = vst [vmem:[%s6112_s26] sm:$0xff] %v3692_v19  ;;  %vm3631_vm4 = vcmp.gt.f32.partialorder %v4916_v14, 0.0  ;;  %v3663_v23 = vmul.f32 5.398, %v4916_v14 }
 0x1d5   : > { %vm3630_vm5 = vcmp.gt.f32.partialorder %v4917_v21, 0.0  ;;  %v3662_v11 = vmul.f32 5.398, %v4917_v21  ;;  %v4872_v25 = vpop.f32.mrb[4].mxu0 }
 0x1d6   : > { %v3695_v27 = vsel %vm3631_vm4, %v4916_v14, %v3663_v23  ;;  %v4918_v29 = vadd.f32 %v4872_v25, %v4622_v34  ;;  %v3457_v31 = vpop.f32.mrb[5].mxu0 }
 0x1d7   : > { %3727 = vst [vmem:[%s6112_s26 + $0x18] sm:$0xff] %v3695_v27  ;;  %v3694_v33 = vsel %vm3630_vm5, %v4917_v21, %v3662_v11  ;;  %v4919_v35 = vadd.f32 %v3457_v31, %v1507_v36 }
 0x1d8   : > { %3726 = vst [vmem:[%s6112_s26 + $0x10] sm:$0xff] %v3694_v33  ;;  %vm3633_vm6 = vcmp.gt.f32.partialorder %v4918_v29, 0.0  ;;  %v3665_v37 = vmul.f32 5.398, %v4918_v29 }
 0x1d9   : > { %vm3632_vm7 = vcmp.gt.f32.partialorder %v4919_v35, 0.0  ;;  %v3664_v39 = vmul.f32 5.398, %v4919_v35  ;;  %v4875_v15 = vpop.f32.mrb[6].mxu0 }
 0x1da   : > { %v3697_v41 = vsel %vm3633_vm6, %v4918_v29, %v3665_v37  ;;  %v4920_v43 = vadd.f32 %v4875_v15, %v4625_v38  ;;  %v3467_v46 = vpop.f32.mrb[7].mxu0 }
 0x1db   : > { %3729 = vst [vmem:[%s6112_s26 + $0x28] sm:$0xff] %v3697_v41  ;;  %v3696_v48 = vsel %vm3632_vm7, %v4919_v35, %v3664_v39  ;;  %v4921_v50 = vadd.f32 %v3467_v46, %v1517_v40 }
 0x1dc   : > { %3728 = vst [vmem:[%s6112_s26 + $0x20] sm:$0xff] %v3696_v48  ;;  %vm3635_vm8 = vcmp.gt.f32.partialorder %v4920_v43, 0.0  ;;  %v3667_v52 = vmul.f32 5.398, %v4920_v43 }
 0x1dd   : > { %vm3634_vm9 = vcmp.gt.f32.partialorder %v4921_v50, 0.0  ;;  %v3666_v54 = vmul.f32 5.398, %v4921_v50  ;;  %v4878_v56 = vpop.f32.mrb[8].mxu0 }
 0x1de   : > { %v3699_v58 = vsel %vm3635_vm8, %v4920_v43, %v3667_v52  ;;  %v4922_v60 = vadd.f32 %v4878_v56, %v4628_v42  ;;  %v3477_v62 = vpop.f32.mrb[9].mxu0 }
 0x1df   : > { %3731 = vst [vmem:[%s6112_s26 + $0x38] sm:$0xff] %v3699_v58  ;;  %v3698_v0 = vsel %vm3634_vm9, %v4921_v50, %v3666_v54  ;;  %v4923_v3 = vadd.f32 %v3477_v62, %v6093_v45 }
 0x1e0   : > { %3730 = vst [vmem:[%s6112_s26 + $0x30] sm:$0xff] %v3698_v0  ;;  %vm3637_vm10 = vcmp.gt.f32.partialorder %v4922_v60, 0.0  ;;  %v3669_v5 = vmul.f32 5.398, %v4922_v60 }
 0x1e1   : > { %vm3636_vm11 = vcmp.gt.f32.partialorder %v4923_v3, 0.0  ;;  %v3668_v7 = vmul.f32 5.398, %v4923_v3  ;;  %v4881_v8 = vpop.f32.mrb[10].mxu0 }
 0x1e2   : > { %v3701_v10 = vsel %vm3637_vm10, %v4922_v60, %v3669_v5  ;;  %v4924_v12 = vadd.f32 %v4881_v8, %v6096_v47  ;;  %v3487_v44 = vpop.f32.mrb[11].mxu0 }
 0x1e3   : > { %3733 = vst [vmem:[%s6112_s26 + $0x48] sm:$0xff] %v3701_v10  ;;  %v3700_v16 = vsel %vm3636_vm11, %v4923_v3, %v3668_v7  ;;  %v4925_v18 = vadd.f32 %v3487_v44, %v6098_v1 }
 0x1e4   : > { %3732 = vst [vmem:[%s6112_s26 + $0x40] sm:$0xff] %v3700_v16  ;;  %vm3639_vm12 = vcmp.gt.f32.partialorder %v4924_v12, 0.0  ;;  %v3671_v9 = vmul.f32 5.398, %v4924_v12 }
 0x1e5   : > { %vm3638_vm13 = vcmp.gt.f32.partialorder %v4925_v18, 0.0  ;;  %v3670_v20 = vmul.f32 5.398, %v4925_v18  ;;  %v4884_v22 = vpop.f32.mrb[12].mxu0 }
 0x1e6   : > { %v3703_v24 = vsel %vm3639_vm12, %v4924_v12, %v3671_v9  ;;  %v4926_v26 = vadd.f32 %v4884_v22, %v6100_v49  ;;  %v3497_v28 = vpop.f32.mrb[13].mxu0 }
 0x1e7   : > { %3735 = vst [vmem:[%s6112_s26 + $0x58] sm:$0xff] %v3703_v24  ;;  %v3702_v30 = vsel %vm3638_vm13, %v4925_v18, %v3670_v20  ;;  %v4927_v32 = vadd.f32 %v3497_v28, %v6102_v51 }
 0x1e8   : > { %3734 = vst [vmem:[%s6112_s26 + $0x50] sm:$0xff] %v3702_v30  ;;  %vm3641_vm14 = vcmp.gt.f32.partialorder %v4926_v26, 0.0  ;;  %v3673_v34 = vmul.f32 5.398, %v4926_v26 }
 0x1e9   : > { %vm3640_vm15 = vcmp.gt.f32.partialorder %v4927_v32, 0.0  ;;  %v3672_v36 = vmul.f32 5.398, %v4927_v32  ;;  %v4887_v38 = vpop.f32.mrb[14].mxu0 }
 0x1ea   : > { %v3705_v40 = vsel %vm3641_vm14, %v4926_v26, %v3673_v34  ;;  %v4928_v42 = vadd.f32 %v4887_v38, %v6105_v53  ;;  %v3507_v45 = vpop.f32.mrb[15].mxu0 }
 0x1eb   : > { %3737 = vst [vmem:[%s6112_s26 + $0x68] sm:$0xff] %v3705_v40  ;;  %v3704_v47 = vsel %vm3640_vm15, %v4927_v32, %v3672_v36  ;;  %v4929_v1 = vadd.f32 %v3507_v45, %v6107_v55 }
 0x1ec   : > { %3736 = vst [vmem:[%s6112_s26 + $0x60] sm:$0xff] %v3704_v47  ;;  %vm3643_vm0 = vcmp.gt.f32.partialorder %v4928_v42, 0.0  ;;  %v3675_v49 = vmul.f32 5.398, %v4928_v42 }
 0x1ed   : > { %vm3642_vm1 = vcmp.gt.f32.partialorder %v4929_v1, 0.0  ;;  %v3674_v51 = vmul.f32 5.398, %v4929_v1  ;;  %v4690_v57 = vpop.f32.mrb[16].mxu1  ;;  %v4890_v59 = vpop.f32.mrb[16].mxu0 }
 0x1ee   : > { %v3707_v61 = vsel %vm3643_vm0, %v4928_v42, %v3675_v49  ;;  %v4930_v63 = vadd.f32 %v4890_v59, %v4690_v57  ;;  %v1957_v2 = vpop.f32.mrb[17].mxu1  ;;  %v3517_v4 = vpop.f32.mrb[17].mxu0 }
 0x1ef   : > { %3739 = vst [vmem:[%s6112_s26 + $0x78] sm:$0xff] %v3707_v61  ;;  %v3706_v53 = vsel %vm3642_vm1, %v4929_v1, %v3674_v51  ;;  %v4931_v13 = vadd.f32 %v3517_v4, %v1957_v2 }
 0x1f0   : > { %3738 = vst [vmem:[%s6112_s26 + $0x70] sm:$0xff] %v3706_v53  ;;  %vm3645_vm2 = vcmp.gt.f32.partialorder %v4930_v63, 0.0  ;;  %v3677_v6 = vmul.f32 5.398, %v4930_v63 }
 0x1f1   : > { %vm3644_vm3 = vcmp.gt.f32.partialorder %v4931_v13, 0.0  ;;  %v3676_v55 = vmul.f32 5.398, %v4931_v13  ;;  %v4693_v14 = vpop.f32.mrb[18].mxu1  ;;  %v4893_v17 = vpop.f32.mrb[18].mxu0 }
 0x1f2   : > { %v3709_v19 = vsel %vm3645_vm2, %v4930_v63, %v3677_v6  ;;  %v4932_v21 = vadd.f32 %v4893_v17, %v4693_v14  ;;  %v1967_v23 = vpop.f32.mrb[19].mxu1  ;;  %v3527_v11 = vpop.f32.mrb[19].mxu0 }
 0x1f3   : > { %3741 = vst [vmem:[%s6112_s26 + $0x88] sm:$0xff] %v3709_v19  ;;  %v3708_v25 = vsel %vm3644_vm3, %v4931_v13, %v3676_v55  ;;  %v4933_v27 = vadd.f32 %v3527_v11, %v1967_v23 }
 0x1f4   : > { %3740 = vst [vmem:[%s6112_s26 + $0x80] sm:$0xff] %v3708_v25  ;;  %vm3647_vm4 = vcmp.gt.f32.partialorder %v4932_v21, 0.0  ;;  %v3679_v29 = vmul.f32 5.398, %v4932_v21 }
 0x1f5   : > { %vm3646_vm5 = vcmp.gt.f32.partialorder %v4933_v27, 0.0  ;;  %v3678_v31 = vmul.f32 5.398, %v4933_v27  ;;  %v4696_v33 = vpop.f32.mrb[20].mxu1  ;;  %v4896_v35 = vpop.f32.mrb[20].mxu0 }
 0x1f6   : > { %v3711_v37 = vsel %vm3647_vm4, %v4932_v21, %v3679_v29  ;;  %v4934_v39 = vadd.f32 %v4896_v35, %v4696_v33  ;;  %v1977_v15 = vpop.f32.mrb[21].mxu1  ;;  %v3537_v41 = vpop.f32.mrb[21].mxu0 }
 0x1f7   : > { %3743 = vst [vmem:[%s6112_s26 + $0x98] sm:$0xff] %v3711_v37  ;;  %v3710_v43 = vsel %vm3646_vm5, %v4933_v27, %v3678_v31  ;;  %v4935_v46 = vadd.f32 %v3537_v41, %v1977_v15 }
 0x1f8   : > { %3742 = vst [vmem:[%s6112_s26 + $0x90] sm:$0xff] %v3710_v43  ;;  %vm3649_vm6 = vcmp.gt.f32.partialorder %v4934_v39, 0.0  ;;  %v3681_v48 = vmul.f32 5.398, %v4934_v39 }
 0x1f9   : > { %vm3648_vm7 = vcmp.gt.f32.partialorder %v4935_v46, 0.0  ;;  %v3680_v50 = vmul.f32 5.398, %v4935_v46  ;;  %v4699_v52 = vpop.f32.mrb[22].mxu1  ;;  %v4899_v54 = vpop.f32.mrb[22].mxu0 }
 0x1fa   : > { %v3713_v56 = vsel %vm3649_vm6, %v4934_v39, %v3681_v48  ;;  %v4936_v58 = vadd.f32 %v4899_v54, %v4699_v52  ;;  %v1987_v60 = vpop.f32.mrb[23].mxu1  ;;  %v3547_v62 = vpop.f32.mrb[23].mxu0 }
 0x1fb   : > { %3745 = vst [vmem:[%s6112_s26 + $0xa8] sm:$0xff] %v3713_v56  ;;  %v3712_v0 = vsel %vm3648_vm7, %v4935_v46, %v3680_v50  ;;  %v4937_v3 = vadd.f32 %v3547_v62, %v1987_v60 }
 0x1fc   : > { %3744 = vst [vmem:[%s6112_s26 + $0xa0] sm:$0xff] %v3712_v0  ;;  %vm3651_vm8 = vcmp.gt.f32.partialorder %v4936_v58, 0.0  ;;  %v3683_v5 = vmul.f32 5.398, %v4936_v58 }
 0x1fd   : > { %vm3650_vm9 = vcmp.gt.f32.partialorder %v4937_v3, 0.0  ;;  %v3682_v7 = vmul.f32 5.398, %v4937_v3  ;;  %v4702_v8 = vpop.f32.mrb[24].mxu1  ;;  %v4902_v10 = vpop.f32.mrb[24].mxu0 }
 0x1fe   : > { %v3715_v12 = vsel %vm3651_vm8, %v4936_v58, %v3683_v5  ;;  %v4938_v44 = vadd.f32 %v4902_v10, %v4702_v8  ;;  %v1997_v16 = vpop.f32.mrb[25].mxu1  ;;  %v3557_v18 = vpop.f32.mrb[25].mxu0 }
 0x1ff   : > { %3747 = vst [vmem:[%s6112_s26 + $0xb8] sm:$0xff] %v3715_v12  ;;  %v3714_v9 = vsel %vm3650_vm9, %v4937_v3, %v3682_v7  ;;  %v4939_v20 = vadd.f32 %v3557_v18, %v1997_v16 }
 0x200   : > { %3746 = vst [vmem:[%s6112_s26 + $0xb0] sm:$0xff] %v3714_v9  ;;  %vm3653_vm10 = vcmp.gt.f32.partialorder %v4938_v44, 0.0  ;;  %v3685_v22 = vmul.f32 5.398, %v4938_v44 }
 0x201   : > { %vm3652_vm11 = vcmp.gt.f32.partialorder %v4939_v20, 0.0  ;;  %v3684_v24 = vmul.f32 5.398, %v4939_v20  ;;  %v4705_v26 = vpop.f32.mrb[26].mxu1  ;;  %v4905_v28 = vpop.f32.mrb[26].mxu0 }
 0x202   : > { %v3717_v30 = vsel %vm3653_vm10, %v4938_v44, %v3685_v22  ;;  %v4940_v32 = vadd.f32 %v4905_v28, %v4705_v26  ;;  %v2007_v34 = vpop.f32.mrb[27].mxu1  ;;  %v3567_v36 = vpop.f32.mrb[27].mxu0 }
 0x203   : > { %3749 = vst [vmem:[%s6112_s26 + $0xc8] sm:$0xff] %v3717_v30  ;;  %v3716_v38 = vsel %vm3652_vm11, %v4939_v20, %v3684_v24  ;;  %v4941_v40 = vadd.f32 %v3567_v36, %v2007_v34 }
 0x204   : > { %3748 = vst [vmem:[%s6112_s26 + $0xc0] sm:$0xff] %v3716_v38  ;;  %vm3655_vm12 = vcmp.gt.f32.partialorder %v4940_v32, 0.0  ;;  %v3687_v42 = vmul.f32 5.398, %v4940_v32 }
 0x205   : > { %vm3654_vm13 = vcmp.gt.f32.partialorder %v4941_v40, 0.0  ;;  %v3686_v45 = vmul.f32 5.398, %v4941_v40  ;;  %v4708_v47 = vpop.f32.mrb[28].mxu1  ;;  %v4908_v1 = vpop.f32.mrb[28].mxu0 }
 0x206   : > { %v3719_v49 = vsel %vm3655_vm12, %v4940_v32, %v3687_v42  ;;  %v4942_v51 = vadd.f32 %v4908_v1, %v4708_v47  ;;  %v2017_v57 = vpop.f32.mrb[29].mxu1  ;;  %v3577_v59 = vpop.f32.mrb[29].mxu0 }
 0x207   : > { %3751 = vst [vmem:[%s6112_s26 + $0xd8] sm:$0xff] %v3719_v49  ;;  %v3718_v61 = vsel %vm3654_vm13, %v4941_v40, %v3686_v45  ;;  %v4943_v63 = vadd.f32 %v3577_v59, %v2017_v57 }
 0x208   : > { %3750 = vst [vmem:[%s6112_s26 + $0xd0] sm:$0xff] %v3718_v61  ;;  %vm3657_vm14 = vcmp.gt.f32.partialorder %v4942_v51, 0.0  ;;  %v3689_v2 = vmul.f32 5.398, %v4942_v51 }
 0x209   : > { %vm3656_vm15 = vcmp.gt.f32.partialorder %v4943_v63, 0.0  ;;  %v3688_v4 = vmul.f32 5.398, %v4943_v63  ;;  %v4711_v53 = vpop.f32.mrb[30].mxu1  ;;  %v4911_v13 = vpop.f32.mrb[30].mxu0 }
 0x20a   : > { %v3721_v6 = vsel %vm3657_vm14, %v4942_v51, %v3689_v2  ;;  %v4944_v55 = vadd.f32 %v4911_v13, %v4711_v53  ;;  %v2027_v14 = vpop.f32.mrb[31].mxu1  ;;  %v3587_v17 = vpop.f32.mrb[31].mxu0 }
 0x20b   : > { %3753 = vst [vmem:[%s6112_s26 + $0xe8] sm:$0xff] %v3721_v6  ;;  %v3720_v19 = vsel %vm3656_vm15, %v4943_v63, %v3688_v4  ;;  %v4945_v21 = vadd.f32 %v3587_v17, %v2027_v14 }
 0x20c   : > { %3752 = vst [vmem:[%s6112_s26 + $0xe0] sm:$0xff] %v3720_v19  ;;  %vm3659_vm0 = vcmp.gt.f32.partialorder %v4944_v55, 0.0  ;;  %v3691_v23 = vmul.f32 5.398, %v4944_v55 }
 0x20d   : > { %vm3658_vm1 = vcmp.gt.f32.partialorder %v4945_v21, 0.0  ;;  %v3690_v11 = vmul.f32 5.398, %v4945_v21 }
 0x20e   : > { %v3723_v25 = vsel %vm3659_vm0, %v4944_v55, %v3691_v23 }
 0x20f   : > { %3755 = vst [vmem:[%s6112_s26 + $0xf8] sm:$0xff] %v3723_v25  ;;  %v3722_v27 = vsel %vm3658_vm1, %v4945_v21, %v3690_v11 }
 0x210   : > { %3754 = vst [vmem:[%s6112_s26 + $0xf0] sm:$0xff] %v3722_v27 }
 0x211 PF: > { %s12_s13 = sadd.s32 1, %s5250_s13   ;;  %s6171_s9 = smov %s5242_s11 }
 0x212   : > { %p9_p8 = scmp.ge.s32.totalorder %s12_s13, 6   ;;  %s6172_s10 = smov %s5246_s12 }
 0x213   : > { %s6173_s11 = smov %s6176_s14  ;;  %s6174_s12 = smov %s6180_s15 }
 0x214   :  { %11 = sbr.rel (!%p9_p8) target bundleno = 3 (0x3), region = 66 }

</bundles_post_ra>
